<compile_context>
chip_gen: v7x
topology: tpu7x:2x2x1
jax: 0.10.0
libtpu: 0.0.40
codegen_flags: <defaults>
</compile_context>

<pallas_src>
import functools

import numpy as np
import jax
import jax.numpy as jnp
from jax.experimental import pallas as pl
from jax.experimental.pallas import tpu as pltpu

KERNEL_SIZES = (3, 4, 5)


def _round_up(x, m):
    return ((x + m - 1) // m) * m


def conv_sent_encoder_kernel(emb_ref, w_ref, b_ref, out_ref, *, kernel_sizes, h_pad):
    """One grid step == TB sentences.

    emb_ref : [TB, S, D]            bf16 embedded tokens
    w_ref   : [D, n_taps * Hpad]    bf16 per-tap conv weights (conv-major / tap-minor;
                                    each tap's H real columns lane-padded to Hpad)
    b_ref   : [n_convs, Hpad]       f32 conv biases (zero in padded columns)
    out_ref : [TB, n_convs * Hpad]  f32 pooled features
    """
    tb, s, d = emb_ref.shape
    x = emb_ref[...].reshape(tb * s, d)                       # row-preserving, free

    # Single fused MXU matmul for every tap of every conv filter (bf16 in, f32 acc).
    y = jnp.dot(x, w_ref[...], preferred_element_type=jnp.float32)
    y = y.reshape(tb, s, -1)                                  # [TB, S, n_taps*Hpad]

    col = 0
    for ci, k in enumerate(kernel_sizes):
        el = s - k + 1                                        # valid conv output length
        # conv_out[b, t, :] = sum_j y[b, t + j, col_j : col_j + Hpad] + bias_ci
        acc = y[:, 0:el, col:col + h_pad] + b_ref[ci:ci + 1, :]
        col += h_pad
        for j in range(1, k):
            acc = acc + y[:, j:j + el, col:col + h_pad]
            col += h_pad
        # ReLU + max-over-time; dense (TB, Hpad) store at a 128-aligned lane offset.
        out_ref[:, ci * h_pad:(ci + 1) * h_pad] = jnp.max(jnp.maximum(acc, 0.0), axis=1)


def conv_sent_encoder(input_ids, params, *, tb=8):
    """input_ids: int32 [B, S] token ids. Returns float32 [B, n_convs * n_hidden]."""
    ks = params["kernel_sizes"]
    h = params["n_hidden"]
    h_pad = params["h_pad"]
    n_convs = len(ks)
    n_out_pad = n_convs * h_pad

    ids = input_ids
    b, s = ids.shape
    assert s >= max(ks), "sequence length must be >= max kernel size"

    # Pad batch to a multiple of TB with padding tokens (id 0 -> zero embedding rows).
    bp = _round_up(b, tb)
    if bp != b:
        ids = jnp.pad(ids, ((0, bp - b), (0, 0)))

    # Embedding lookup directly in bf16 (halves HBM materialize + re-read traffic).
    emb = jnp.take(params["embedding_bf16"], ids, axis=0)     # [Bp, S, D] bf16
    d = emb.shape[-1]
    w_cat = params["w_cat"]                                   # [D, n_taps*Hpad] bf16
    b_pad = params["b_pad"]                                   # [n_convs, Hpad]  f32

    kernel = functools.partial(conv_sent_encoder_kernel, kernel_sizes=ks, h_pad=h_pad)
    out = pl.pallas_call(
        kernel,
        out_shape=jax.ShapeDtypeStruct((bp, n_out_pad), jnp.float32),
        grid=(bp // tb,),
        in_specs=[
            pl.BlockSpec((tb, s, d), lambda i: (i, 0, 0)),
            pl.BlockSpec(w_cat.shape, lambda i: (0, 0)),
            pl.BlockSpec(b_pad.shape, lambda i: (0, 0)),
        ],
        out_specs=pl.BlockSpec((tb, n_out_pad), lambda i: (i, 0)),
        compiler_params=pltpu.CompilerParams(
            dimension_semantics=("parallel",)),
    )(emb, w_cat, b_pad)

    # Strip padded batch rows and padded feature columns -> [B, n_convs*H].
    return jnp.concatenate(
        [out[:b, ci * h_pad:ci * h_pad + h] for ci in range(n_convs)], axis=1)


def make_params(key, vocab_size, emb_dim, n_hidden, kernel_sizes=KERNEL_SIZES):
    h_pad = _round_up(n_hidden, 128)
    keys = jax.random.split(key, 1 + 2 * len(kernel_sizes))
    emb = jax.random.normal(keys[0], (vocab_size, emb_dim), jnp.float32) * 0.1
    emb = emb.at[0].set(0.0)                                   # padding_idx=0 row is zero
    conv_w, conv_b = [], []
    for i, k in enumerate(kernel_sizes):
        bound = 1.0 / np.sqrt(emb_dim * k)
        conv_w.append(jax.random.uniform(keys[1 + 2 * i], (n_hidden, emb_dim, k),
                                         jnp.float32, -bound, bound))
        conv_b.append(jax.random.uniform(keys[2 + 2 * i], (n_hidden,),
                                         jnp.float32, -bound, bound))
    # Per-tap weights [D, Hpad] (lane-padded with exact zeros), conv-major / tap-minor.
    cols = []
    for w in conv_w:                                           # [H, D, k]
        for j in range(w.shape[2]):
            tap = jnp.zeros((emb_dim, h_pad), jnp.float32).at[:, :n_hidden].set(w[:, :, j].T)
            cols.append(tap)
    w_cat = jnp.concatenate(cols, axis=1).astype(jnp.bfloat16)  # [D, n_taps*Hpad]
    b_pad = jnp.stack([jnp.zeros((h_pad,), jnp.float32).at[:n_hidden].set(bb)
                       for bb in conv_b], axis=0)               # [n_convs, Hpad]
    return {"embedding": emb, "embedding_bf16": emb.astype(jnp.bfloat16),
            "conv_w": conv_w, "conv_b": conv_b,
            "w_cat": w_cat, "b_pad": b_pad,
            "kernel_sizes": kernel_sizes, "n_hidden": n_hidden, "h_pad": h_pad}


def reference_forward(input_ids, params):
    """Pure-numpy (f64) re-implementation of the PyTorch eval-mode forward."""
    emb_w = np.asarray(params["embedding"], dtype=np.float64)
    ids = np.asarray(input_ids)
    emb = emb_w[ids]                                           # [B, S, D]
    B, S, D = emb.shape
    feats = []
    for k, w, b in zip(params["kernel_sizes"], params["conv_w"], params["conv_b"]):
        w = np.asarray(w, dtype=np.float64)                    # [H, D, k]
        b = np.asarray(b, dtype=np.float64)                    # [H]
        L = S - k + 1
        conv = np.zeros((B, L, w.shape[0]))
        for t in range(L):
            conv[:, t, :] = np.einsum("bjd,hdj->bh", emb[:, t:t + k, :], w) + b
        feats.append(np.maximum(conv, 0.0).max(axis=1))        # ReLU + max-over-time
    return np.concatenate(feats, axis=1)                       # [B, 3H]


if __name__ == "__main__":
    key = jax.random.PRNGKey(0)
    kp, kx = jax.random.split(key)
    vocab, B, S, D, H = 128, 16, 16, 32, 32                    # small demo shapes

    params = make_params(kp, vocab, D, H)
    ids = jax.random.randint(kx, (B, S), 0, vocab, dtype=jnp.int32)
    ids = ids.at[:, -3:].set(0)                                # trailing padding tokens

    out = conv_sent_encoder(ids, params, tb=8)                 # grid = 2 batch blocks
    out = jax.block_until_ready(out)

    ref = reference_forward(ids, params)
    err = np.max(np.abs(np.asarray(out, dtype=np.float64) - ref))
    # bf16 matmul inputs -> loosened parity tolerance vs the f64 reference.
    assert np.allclose(np.asarray(out), ref, atol=1e-2, rtol=1e-2), f"max abs err {err}"
    print("KERNEL_OK")
</pallas_src>

<mosaic_0001>
module attributes {stable_mosaic.version = 11 : i64} {
  func.func @conv_sent_encoder_kernel(%arg0: i32, %arg1: memref<8x16x32xbf16, #tpu.memory_space<vmem>>, %arg2: memref<32x1536xbf16, #tpu.memory_space<vmem>>, %arg3: memref<3x128xf32, #tpu.memory_space<vmem>>, %arg4: memref<8x384xf32, #tpu.memory_space<vmem>>) attributes {dimension_semantics = [#tpu.dimension_semantics<parallel>], iteration_bounds = array<i64: 2>, scalar_prefetch = 0 : i64, scratch_operands = 0 : i64, tpu.core_type = #tpu.core_type<tc>, window_params = [{transform_indices = @transform_0, window_bounds = array<i64: 8, 16, 32>}, {pipeline_mode = #tpu.pipeline_mode<synchronous>, transform_indices = @transform_1, window_bounds = array<i64: 32, 1536>}, {pipeline_mode = #tpu.pipeline_mode<synchronous>, transform_indices = @transform_2, window_bounds = array<i64: 3, 128>}, {transform_indices = @transform_3, window_bounds = array<i64: 8, 384>}]} {
    %c0 = arith.constant 0 : index
    %c0_0 = arith.constant 0 : index
    %c0_1 = arith.constant 0 : index
    %0 = vector.load %arg1[%c0, %c0_0, %c0_1] : memref<8x16x32xbf16, #tpu.memory_space<vmem>>, vector<8x16x32xbf16>
    %1 = vector.shape_cast %0 : vector<8x16x32xbf16> to vector<128x32xbf16>
    %c0_2 = arith.constant 0 : index
    %c0_3 = arith.constant 0 : index
    %2 = vector.load %arg2[%c0_2, %c0_3] : memref<32x1536xbf16, #tpu.memory_space<vmem>>, vector<32x1536xbf16>
    %cst = arith.constant dense<0.000000e+00> : vector<128x1536xf32>
    %3 = tpu.matmul %1, %2, %cst {dimension_numbers = #tpu.dot_dimension_numbers<[1], [0], [0], [1], [0, 0, 1, 1], [], []>} : vector<128x32xbf16>, vector<32x1536xbf16>, vector<128x1536xf32> -> vector<128x1536xf32>
    %4 = vector.shape_cast %3 : vector<128x1536xf32> to vector<8x16x1536xf32>
    %5 = vector.extract_strided_slice %4 {offsets = [0, 0, 0], sizes = [8, 14, 128], strides = [1, 1, 1]} : vector<8x16x1536xf32> to vector<8x14x128xf32>
    %c0_4 = arith.constant 0 : index
    %c0_5 = arith.constant 0 : index
    %6 = vector.load %arg3[%c0_4, %c0_5] : memref<3x128xf32, #tpu.memory_space<vmem>>, vector<1x128xf32>
    %7 = vector.shape_cast %6 : vector<1x128xf32> to vector<1x1x128xf32>
    %8 = vector.broadcast %7 : vector<1x1x128xf32> to vector<8x14x128xf32>
    %9 = arith.addf %5, %8 : vector<8x14x128xf32>
    %10 = vector.extract_strided_slice %4 {offsets = [0, 1, 128], sizes = [8, 14, 128], strides = [1, 1, 1]} : vector<8x16x1536xf32> to vector<8x14x128xf32>
    %11 = arith.addf %9, %10 : vector<8x14x128xf32>
    %12 = vector.extract_strided_slice %4 {offsets = [0, 2, 256], sizes = [8, 14, 128], strides = [1, 1, 1]} : vector<8x16x1536xf32> to vector<8x14x128xf32>
    %13 = arith.addf %11, %12 : vector<8x14x128xf32>
    %cst_6 = arith.constant 0.000000e+00 : f32
    %14 = vector.broadcast %cst_6 : f32 to vector<8x14x128xf32>
    %15 = arith.maximumf %13, %14 : vector<8x14x128xf32>
    %cst_7 = arith.constant dense<0xFF800000> : vector<8x128xf32>
    %16 = vector.multi_reduction <maximumf>, %15, %cst_7 [1] : vector<8x14x128xf32> to vector<8x128xf32>
    %c0_8 = arith.constant 0 : index
    %c0_9 = arith.constant 0 : index
    %17 = vector.load %arg4[%c0_8, %c0_9] : memref<8x384xf32, #tpu.memory_space<vmem>>, vector<8x128xf32>
    tpu.vector_store %arg4[%c0_8, %c0_9], %16 {strides = array<i32>} : memref<8x384xf32, #tpu.memory_space<vmem>>, vector<8x128xf32>,
    %18 = vector.extract_strided_slice %4 {offsets = [0, 0, 384], sizes = [8, 13, 128], strides = [1, 1, 1]} : vector<8x16x1536xf32> to vector<8x13x128xf32>
    %c1 = arith.constant 1 : index
    %c0_10 = arith.constant 0 : index
    %19 = vector.load %arg3[%c1, %c0_10] : memref<3x128xf32, #tpu.memory_space<vmem>>, vector<1x128xf32>
    %20 = vector.shape_cast %19 : vector<1x128xf32> to vector<1x1x128xf32>
    %21 = vector.broadcast %20 : vector<1x1x128xf32> to vector<8x13x128xf32>
    %22 = arith.addf %18, %21 : vector<8x13x128xf32>
    %23 = vector.extract_strided_slice %4 {offsets = [0, 1, 512], sizes = [8, 13, 128], strides = [1, 1, 1]} : vector<8x16x1536xf32> to vector<8x13x128xf32>
    %24 = arith.addf %22, %23 : vector<8x13x128xf32>
    %25 = vector.extract_strided_slice %4 {offsets = [0, 2, 640], sizes = [8, 13, 128], strides = [1, 1, 1]} : vector<8x16x1536xf32> to vector<8x13x128xf32>
    %26 = arith.addf %24, %25 : vector<8x13x128xf32>
    %27 = vector.extract_strided_slice %4 {offsets = [0, 3, 768], sizes = [8, 13, 128], strides = [1, 1, 1]} : vector<8x16x1536xf32> to vector<8x13x128xf32>
    %28 = arith.addf %26, %27 : vector<8x13x128xf32>
    %cst_11 = arith.constant 0.000000e+00 : f32
    %29 = vector.broadcast %cst_11 : f32 to vector<8x13x128xf32>
    %30 = arith.maximumf %28, %29 : vector<8x13x128xf32>
    %cst_12 = arith.constant dense<0xFF800000> : vector<8x128xf32>
    %31 = vector.multi_reduction <maximumf>, %30, %cst_12 [1] : vector<8x13x128xf32> to vector<8x128xf32>
    %c0_13 = arith.constant 0 : index
    %c128 = arith.constant 128 : index
    %32 = vector.load %arg4[%c0_13, %c128] : memref<8x384xf32, #tpu.memory_space<vmem>>, vector<8x128xf32>
    tpu.vector_store %arg4[%c0_13, %c128], %31 {strides = array<i32>} : memref<8x384xf32, #tpu.memory_space<vmem>>, vector<8x128xf32>,
    %33 = vector.extract_strided_slice %4 {offsets = [0, 0, 896], sizes = [8, 12, 128], strides = [1, 1, 1]} : vector<8x16x1536xf32> to vector<8x12x128xf32>
    %c2 = arith.constant 2 : index
    %c0_14 = arith.constant 0 : index
    %34 = vector.load %arg3[%c2, %c0_14] : memref<3x128xf32, #tpu.memory_space<vmem>>, vector<1x128xf32>
    %35 = vector.shape_cast %34 : vector<1x128xf32> to vector<1x1x128xf32>
    %36 = vector.broadcast %35 : vector<1x1x128xf32> to vector<8x12x128xf32>
    %37 = arith.addf %33, %36 : vector<8x12x128xf32>
    %38 = vector.extract_strided_slice %4 {offsets = [0, 1, 1024], sizes = [8, 12, 128], strides = [1, 1, 1]} : vector<8x16x1536xf32> to vector<8x12x128xf32>
    %39 = arith.addf %37, %38 : vector<8x12x128xf32>
    %40 = vector.extract_strided_slice %4 {offsets = [0, 2, 1152], sizes = [8, 12, 128], strides = [1, 1, 1]} : vector<8x16x1536xf32> to vector<8x12x128xf32>
    %41 = arith.addf %39, %40 : vector<8x12x128xf32>
    %42 = vector.extract_strided_slice %4 {offsets = [0, 3, 1280], sizes = [8, 12, 128], strides = [1, 1, 1]} : vector<8x16x1536xf32> to vector<8x12x128xf32>
    %43 = arith.addf %41, %42 : vector<8x12x128xf32>
    %44 = vector.extract_strided_slice %4 {offsets = [0, 4, 1408], sizes = [8, 12, 128], strides = [1, 1, 1]} : vector<8x16x1536xf32> to vector<8x12x128xf32>
    %45 = arith.addf %43, %44 : vector<8x12x128xf32>
    %cst_15 = arith.constant 0.000000e+00 : f32
    %46 = vector.broadcast %cst_15 : f32 to vector<8x12x128xf32>
    %47 = arith.maximumf %45, %46 : vector<8x12x128xf32>
    %cst_16 = arith.constant dense<0xFF800000> : vector<8x128xf32>
    %48 = vector.multi_reduction <maximumf>, %47, %cst_16 [1] : vector<8x12x128xf32> to vector<8x128xf32>
    %c0_17 = arith.constant 0 : index
    %c256 = arith.constant 256 : index
    %49 = vector.load %arg4[%c0_17, %c256] : memref<8x384xf32, #tpu.memory_space<vmem>>, vector<8x128xf32>
    tpu.vector_store %arg4[%c0_17, %c256], %48 {strides = array<i32>} : memref<8x384xf32, #tpu.memory_space<vmem>>, vector<8x128xf32>,
    return
  }
  func.func @transform_0(%arg0: i32) -> (i32, i32, i32) {
    %c0_i32 = arith.constant 0 : i32
    %c0_i32_0 = arith.constant 0 : i32
    %c0_i32_1 = arith.constant 0 : i32
    return %arg0, %c0_i32, %c0_i32_0 : i32, i32, i32
  }
  func.func @transform_1(%arg0: i32) -> (i32, i32) {
    %c0_i32 = arith.constant 0 : i32
    %c0_i32_0 = arith.constant 0 : i32
    %c0_i32_1 = arith.constant 0 : i32
    return %c0_i32, %c0_i32_0 : i32, i32
  }
  func.func @transform_2(%arg0: i32) -> (i32, i32) {
    %c0_i32 = arith.constant 0 : i32
    %c0_i32_0 = arith.constant 0 : i32
    %c0_i32_1 = arith.constant 0 : i32
    return %c0_i32, %c0_i32_0 : i32, i32
  }
  func.func @transform_3(%arg0: i32) -> (i32, i32) {
    %c0_i32 = arith.constant 0 : i32
    %c0_i32_0 = arith.constant 0 : i32
    return %arg0, %c0_i32 : i32, i32
  }
}

</mosaic_0001>

<bundles_post_ra>
// kernel: tpu_custom_call.1
= control target key start
LH: loop header
LB: loop body
LE: loop exit
PB: predicated region body
PF: predicated region fallthrough
CT: control target
= control target key end

     0   :  { %8 = vsyncpa [#allocation3], 0  ;;  %s3279_s0 = inlined_call_operand.hbm [shape: bf16[16,16,32], index: 0, kind: input, shape index: {}]   ;;  %s3280_s1 = inlined_call_operand.hbm [shape: bf16[32,1536], index: 1, kind: input, shape index: {}]   ;;  %s3281_s2 = inlined_call_operand.vmem [shape: f32[3,128], index: 2, kind: input, shape index: {}]   ;;  %s3282_s3 = inlined_call_operand.hbm [shape: f32[16,384], index: 3, kind: output, shape index: {}]  }
   0x1   :  { %10 = vsyncpa [#allocation3 + $0x1], 0 }
   0x2   :  { %11 = vsyncpa [#allocation6], 0 }
   0x3   :  { %12 = vsyncpa [#allocation4], 0 }
   0x4   :  { %14 = vsyncpa [#allocation4 + $0x1], 0  ;;  %s2583_s12 = smov 0   ;;  %s2585_s13 = smov 0  }
   0x5   :  { %s2587_s14 = smov 0   ;;  %s2589_s15 = smov 0  }
   0x6 LB: > { %s2604_s16 = sadd.s32 4294967295, %s2553_s15   ;;  %s2218_s17 = sadd.s32 4294967294, %s2553_s15   ;;  %s2553_s15 = sphi %s2589_s15, %s3302_s15   ;;  %s2549_s14 = sphi %s2587_s14, %s3301_s14   ;;  %s2545_s13 = sphi %s2585_s13, %s3300_s13   ;;  %s2541_s12 = sphi %s2583_s12, %s3299_s12  }
   0x7   : > { %p40_p0 = scmp.ne.s32.totalorder %s2545_s13, %s2541_s12  ;;  %p3283_p1 = scmp.eq.s32.totalorder %s2604_s16, 0 }
   0x8   : > { %p112_p3 = scmp.eq.s32.totalorder %s2218_s17, 1  ;;  %p2219_p5 = scmp.ge.s32.totalorder %s2553_s15, 1 }
   0x9   : > { %p2613_p4 = por %p3283_p1, %p40_p0  ;;  %p119_p7 = scmp.lt.s32.totalorder %s2553_s15, 3 }
   0xa   : > { %p2618_p6 = por %p112_p3, %p40_p0  ;;  %s2555_s21 = smov [#allocation5]  }
   0xb   : > { %s3286_s18 = scalar_select %p2613_p4, 1, 0 }
   0xc   : > { %s3287_s19 = scalar_select %p2618_p6, 1, 0 }
   0xd   : > { %p2623_p8 = pnand %p2219_p5, %p119_p7  ;;  %s131_s22 = sshll.u32 %s2555_s21, 4  ;;  %s2627_s22 = int_to_ptr.vmem [resolvable:$true] %s131_s22 }
   0xe   : > { %s2639_s24 = sadd.s32 1, %s2553_s15   ;;  %s27_s25 = sadd.s32 1, %s2549_s14 }
   0xf   : > { %s3288_s20 = scalar_select %p2623_p8, 1, 0 }
  0x10   : > { %p2327_p9 = pneg %p2623_p8  ;;  %s24_s26 = ssub.s32 %s2553_s15, %s2639_s24 }
  0x11   : > { %s2425_s29 = scalar_lea.hbm %s3280_s1, 3072 }
  0x12   : > { %p2634_p11 = pnand %p2327_p9, %p3283_p1  ;;  %p2426_p12 = scmp.ne.s32.totalorder %s3280_s1, %s2425_s29 }
  0x13   : > { %p2432_p5 = scmp.lt.u32.totalorder %s2425_s29, %s3280_s1 }
  0x14   : > { %p2427_p13 = pneg %p2634_p11 }
  0x16   : > { %p2428_p0 = pnand %p2427_p13, %p2426_p12 }
  0x18   : > { %p2429_p3 = pneg %p2428_p0 }
  0x1a   : > { %p2434_p7 = pnand %p2432_p5, %p2429_p3 }
  0x1c   : > { %2437 = shalt.err (!%p2434_p7)
}
  0x1d   : > { %s2438_s7 = scalar_lea.vmem %s2627_s22, 3072  ;;  %p2446_p2 = scmp.lt.s32.totalorder %s2627_s22, %s2627_s22 }
  0x1e   : > { %p2439_p9 = scmp.ne.s32.totalorder %s2627_s22, %s2438_s7  ;;  %p2447_p6 = scmp.lt.s32.totalorder %s2438_s7, %s2438_s7 }
  0x20   : > { %p2441_p10 = pnand %p2439_p9, %p2427_p13  ;;  %p2448_p4 = por %p2447_p6, %p2446_p2 }
  0x22   : > { %p2442_p1 = pneg %p2441_p10 }
  0x24   : > { %p2449_p8 = pnand %p2448_p4, %p2442_p1 }
  0x26   : > { %2452 = shalt.err (!%p2449_p8)
}
  0x27   : > { %s2556_s8 = smov 768   ;;  %s2557_s9 = smov 48  }
  0x28   : > { %2330 = dma.hbm_to_vmem [thread:$0]  (!%p2634_p11), %s3280_s1, 3072, %s2627_s22, [#allocation6], %s2556_s8, %s2556_s8, %s2557_s9  }
  0x29   : > { %p25_p2 = scmp.eq.s32.totalorder %s24_s26, 0  ;;  %p34_p1 = scmp.ne.s32.totalorder %s2549_s14, %s2545_s13 }
  0x2a   : > { %p35_p4 = scmp.eq.s32.totalorder %s2553_s15, 0  ;;  %p2340_p6 = scmp.lt.s32.totalorder %s2553_s15, 2 }
  0x2b   : > { %s2670_s17 = scalar_select %p25_p2, %s2549_s14, %s27_s25  }
  0x2c   : > { %p36_p8 = por %p35_p4, %p34_p1  ;;  %p3290_p10 = scmp.eq.s32.totalorder %s2604_s16, 1 }
  0x2d   : > { %s148_s27 = sand.u32 1, %s2549_s14   ;;  %s2316_s28 = sshll.u32 %s2553_s15, 10 }
  0x2e   : > { %p2674_p12 = por %p3290_p10, %p34_p1  ;;  %s2222_s29 = sshll.u32 %s148_s27, 6 }
  0x2f   : > { %s2683_s4 = scalar_lea.hbm %s3279_s0, %s2316_s28  ;;  %s152_s22 = scalar_lea.vmem [#allocation2], %s2222_s29 }
  0x30   : > { %s160_s25 = sshll.u32 %s152_s22, 4  ;;  %p2685_p11 = pnand %p2340_p6, %p36_p8  ;;  %s2689_s25 = int_to_ptr.vmem [resolvable:$true] %s160_s25 }
  0x31   : > { %s2691_s5 = scalar_lea.sflag [#allocation3], %s148_s27  ;;  %s2453_s6 = scalar_lea.hbm %s2683_s4, 1024 }
  0x32   : > { %p2454_p13 = scmp.ne.s32.totalorder %s2683_s4, %s2453_s6  ;;  %p2455_p0 = pneg %p2685_p11 }
  0x33   : > { %s2458_s9 = scalar_lea.hbm %s3279_s0, 2048  ;;  %p2459_p7 = scmp.lt.u32.totalorder %s2683_s4, %s3279_s0 }
  0x34   : > { %p2456_p3 = pnand %p2455_p0, %p2454_p13  ;;  %p2460_p9 = scmp.lt.u32.totalorder %s2458_s9, %s2453_s6 }
  0x35   : > { %p2462_p1 = scmp.lt.u32.totalorder %s2453_s6, %s2683_s4 }
  0x36   : > { %p2457_p5 = pneg %p2456_p3  ;;  %p2461_p2 = por %p2460_p9, %p2459_p7 }
  0x38   : > { %p2463_p4 = por %p2462_p1, %p2461_p2 }
  0x3a   : > { %p2464_p6 = pnand %p2463_p4, %p2457_p5 }
  0x3c   : > { %2467 = shalt.err (!%p2464_p6)
}
  0x3d   : > { %s2468_s27 = scalar_lea.vmem %s2689_s25, 1024  ;;  %s2558_s28 = smov [#allocation2]  }
  0x3e   : > { %p2469_p8 = scmp.ne.s32.totalorder %s2689_s25, %s2468_s27  ;;  %s2473_s29 = sshll.u32 %s2558_s28, 4  ;;  %s2474_s29 = int_to_ptr.vmem [resolvable:$false] %s2473_s29 }
  0x3f   : > { %s2475_s23 = scalar_lea.vmem %s2474_s29, 2048  ;;  %p2476_p3 = scmp.lt.s32.totalorder %s2689_s25, %s2474_s29 }
  0x40   : > { %p2471_p10 = pnand %p2469_p8, %p2455_p0  ;;  %p2477_p7 = scmp.lt.s32.totalorder %s2475_s23, %s2468_s27 }
  0x42   : > { %p2472_p13 = pneg %p2471_p10  ;;  %p2478_p9 = por %p2477_p7, %p2476_p3 }
  0x44   : > { %p2479_p2 = pnand %p2478_p9, %p2472_p13 }
  0x46   : > { %2482 = shalt.err (!%p2479_p2)
}
  0x47   : > { %s2559_s30 = smov 64   ;;  %s2560_s22 = smov 4  }
  0x48   : > { %2334 = dma.hbm_to_vmem [thread:$0]  (!%p2685_p11), %s2683_s4, 1024, %s2689_s25, %s2691_s5, %s2559_s30, %s2559_s30, %s2560_s22  }
  0x49   : > { %p3293_p0 = scmp.ne.s32.totalorder %s3288_s20, 0 }
  0x4a   : > { %s2722_s6 = sand.u32 (!%p3293_p0), 1, %s2545_s13   ;;  %p3294_p5 = scmp.ne.s32.totalorder (!%p3293_p0), %s3286_s18, 0 }
  0x4b   : > { %172 = sbr.rel (%p3293_p0) target bundleno = 536 (0x218), region = 32  ;;  %s2227_s7 = sshll.u32 (!%p3293_p0), %s2722_s6, 6 }
  0x4c   : > { %s175_s8 = scalar_lea.sflag (!%p3293_p0), [#allocation3], %s2722_s6  ;;  %s2726_s9 = scalar_lea.vmem (!%p3293_p0), [#allocation2], %s2227_s7 }
  0x52   : > { %2528 = dma.done.wait (%p3294_p5), %s175_s8, 1024  }
  0x53   : > { %2530 = vsyncadd (%p3294_p5), %s175_s8, 4294966272  ;;  %p3295_p11 = scmp.eq.s32.totalorder %s2604_s16, 0 }
  0x55   : > { %2532 = dma.done.wait (%p3295_p11), [#allocation6], 3072   ;;  %p3296_p1 = pmov %p3295_p11 }
  0x56   : > { %v2561_v0 = vmov 0   ;;  %v2381_v1 = vld [vmem:[#allocation5 + $0x4] ss:$48 sps:$4 sm:$0xff]   ;;  %v2383_v2 = vld [vmem:[#allocation5] ss:$48 sps:$4 sm:$0xff]   ;;  %vm407_vm0 = vcmask 261120  }
  0x57   : > { %2534 = vsyncadd (%p3296_p1), [#allocation6], 4294964224  ;;  %464 = vmatprep.mubr.bf16.mxu0 %v2561_v0  ;;  %577 = vmatprep.mubr.bf16.mxu1 %v2561_v0  ;;  %v2384_v3 = vld [vmem:[#allocation5 + $0xc] ss:$48 sps:$4 sm:$0xff]   ;;  %v2386_v4 = vld [vmem:[#allocation5 + $0x8] ss:$48 sps:$4 sm:$0xff]  }
  0x58   : > { %432 = vmatprep.subr.bf16.mxu0 %v2381_v1  ;;  %v2387_v5 = vld [vmem:[#allocation5 + $0x64] ss:$48 sps:$4 sm:$0xff]   ;;  %v2389_v6 = vld [vmem:[#allocation5 + $0x60] ss:$48 sps:$4 sm:$0xff]   ;;  %545 = vmatprep.subr.bf16.mxu1 %v2384_v3  ;;  %v2390_v7 = vld [vmem:[#allocation5 + $0x6c] ss:$48 sps:$4 sm:$0xff]  }
  0x59   : > { %433 = vmatpush1.bf16.msra.mxu0 %v2383_v2  ;;  %546 = vmatpush1.bf16.msra.mxu1 %v2386_v4  ;;  %v2392_v8 = vld [vmem:[#allocation5 + $0x68] ss:$48 sps:$4 sm:$0xff]   ;;  %v2739_v9 = vld [vmem:[%s2726_s9] sm:$0xff]   ;;  %v2399_v12 = vld [vmem:[#allocation5 + $0x1c] ss:$48 sps:$4 sm:$0xff]   ;;  %vm1147_vm1 = vcmask 1046528  }
  0x5a   : > { %434 = vmatprep.subr.bf16.mxu0 %v2387_v5  ;;  %547 = vmatprep.subr.bf16.mxu1 %v2390_v7  ;;  %v2394_v10 = vld [vmem:[#allocation5 + $0x10] ss:$48 sps:$4 sm:$0xff]   ;;  %v2396_v11 = vld [vmem:[#allocation5 + $0x14] ss:$48 sps:$4 sm:$0xff]   ;;  %v2397_v13 = vld [vmem:[#allocation5 + $0x18] ss:$48 sps:$4 sm:$0xff]  }
  0x5b   : > { %v2747_v14 = vld [vmem:[%s2726_s9 + $0x8] sm:$0xff]   ;;  %v2404_v15 = vld [vmem:[#allocation5 + $0x70] ss:$48 sps:$4 sm:$0xff]   ;;  %v2406_v16 = vld [vmem:[#allocation5 + $0x74] ss:$48 sps:$4 sm:$0xff]   ;;  %vm1220_vm2 = vcmask 1045504  }
  0x5c   : > { %v2407_v17 = vld [vmem:[#allocation5 + $0x78] ss:$48 sps:$4 sm:$0xff]   ;;  %v2409_v18 = vld [vmem:[#allocation5 + $0x7c] ss:$48 sps:$4 sm:$0xff]   ;;  %v2415_v19 = vld [vmem:[#allocation5 + $0x24] ss:$48 sps:$4 sm:$0xff]  }
  0x5d   : > { %435 = vmatpush1.bf16.msra.mxu0 %v2389_v6  ;;  %548 = vmatpush1.bf16.msra.mxu1 %v2392_v8  ;;  %v2418_v20 = vld [vmem:[#allocation5 + $0x2c] ss:$48 sps:$4 sm:$0xff]   ;;  %v2757_v21 = vld [vmem:[%s2726_s9 + $0x10] sm:$0xff]   ;;  %v2775_v23 = vld [vmem:[%s2726_s9 + $0x20] sm:$0xff]   ;;  %vm1365_vm3 = vcmask 1041409   ;;  %vm1367_vm4 = vcmask 1042434  }
  0x5e   : > { %658 = vmatprep.subr.bf16.mxu0 %v2396_v11  ;;  %771 = vmatprep.subr.bf16.mxu1 %v2399_v12  ;;  %v2766_v22 = vld [vmem:[%s2726_s9 + $0x18] sm:$0xff]   ;;  %v2784_v24 = vld [vmem:[%s2726_s9 + $0x28] sm:$0xff]   ;;  %v2793_v25 = vld [vmem:[%s2726_s9 + $0x30] sm:$0xff]   ;;  %vm1369_vm5 = vcmask 1043459   ;;  %vm1371_vm6 = vcmask 1044484   ;;  %vm1373_vm7 = vcmask 1045509  }
  0x5f   : > { %v2802_v26 = vld [vmem:[%s2726_s9 + $0x38] sm:$0xff]   ;;  %v2413_v27 = vld [vmem:[#allocation5 + $0x20] ss:$48 sps:$4 sm:$0xff]   ;;  %v2421_v28 = vld [vmem:[#allocation5 + $0x84] ss:$48 sps:$4 sm:$0xff]   ;;  %vm1562_vm8 = vcmask 1044480  }
  0x60   : > { %2261 = vmatmul.mubr.msk.bf16.vlgmr.msra.gmra.mrb[0].mxu0 %vm407_vm0, %v2739_v9  ;;  %2269 = vmatmul.mubr.msk.bf16.vlgmr.msra.gmra.mrb[0].mxu1 %vm407_vm0, %v2739_v9  ;;  %v2416_v29 = vld [vmem:[#allocation5 + $0x28] ss:$48 sps:$4 sm:$0xff]   ;;  %v2424_v30 = vld [vmem:[#allocation5 + $0x8c] ss:$48 sps:$4 sm:$0xff]   ;;  %v2419_v31 = vld [vmem:[#allocation5 + $0x80] ss:$48 sps:$4 sm:$0xff]  }
  0x61   : > { %659 = vmatpush1.bf16.msra.mxu0 %v2394_v10  ;;  %474 = vmatprep.mubr.bf16.mxu0 %v2561_v0  ;;  %v2422_v32 = vld [vmem:[#allocation5 + $0x88] ss:$48 sps:$4 sm:$0xff]   ;;  %v2907_v35 = vld [vmem:[%s3281_s2] ss:$0 sm:$0xff]  ;;  %vm1375_vm9 = vcmask 1046534   ;;  %s2317_s26 = smul.u32 24, %s2722_s6 }
  0x62   : > { %772 = vmatpush1.bf16.msra.mxu1 %v2397_v13  ;;  %587 = vmatprep.mubr.bf16.mxu1 %v2561_v0  ;;  %vm1377_vm10 = vcmask 1047559   ;;  %vm1969_vm11 = vcmask 1043456   ;;  %s2318_s27 = smul.u32 384, %s2604_s16  ;;  %s2124_s22 = scalar_lea.sflag [#allocation4], %s2722_s6 }
  0x63   : > { %660 = vmatprep.subr.bf16.mxu0 %v2406_v16  ;;  %773 = vmatprep.subr.bf16.mxu1 %v2409_v18  ;;  %s3025_s5 = scalar_lea.vmem [#allocation7], %s2317_s26  ;;  %s2562_s16 = smov [#allocation7]  }
  0x64   : > { %s2138_s28 = sshll.u32 %s3025_s5, 4  ;;  %s3233_s30 = scalar_lea.hbm %s3282_s3, %s2318_s27  ;;  %s3235_s28 = int_to_ptr.vmem [resolvable:$true] %s2138_s28 }
  0x65   : > { %661 = vmatpush1.bf16.msra.mxu0 %v2404_v15  ;;  %s2483_s7 = scalar_lea.vmem %s3235_s28, 384  ;;  %s2487_s8 = sshll.u32 %s2562_s16, 4  ;;  %s2488_s8 = int_to_ptr.vmem [resolvable:$false] %s2487_s8 }
  0x66   : > { %774 = vmatpush1.bf16.msra.mxu1 %v2407_v17  ;;  %884 = vmatprep.subr.bf16.mxu0 %v2415_v19  ;;  %p2484_p4 = scmp.ne.s32.totalorder %s3235_s28, %s2483_s7  ;;  %s2489_s9 = scalar_lea.vmem %s2488_s8, 768 }
  0x67   : > { %997 = vmatprep.subr.bf16.mxu1 %v2418_v20  ;;  %p2490_p10 = scmp.lt.s32.totalorder %s3235_s28, %s2488_s8  ;;  %p2491_p13 = scmp.lt.s32.totalorder %s2489_s9, %s2483_s7 }
  0x68   : > { %2262 = vmatmul.mubr.msk.bf16.gmra.mrb[4].mxu0 %vm407_vm0, %v2747_v14  ;;  %2270 = vmatmul.mubr.msk.bf16.gmra.mrb[4].mxu1 %vm407_vm0, %v2747_v14  ;;  %p2485_p6 = pnand %p2484_p4, %p2674_p12 }
  0x69   : > { %484 = vmatprep.mubr.bf16.mxu0 %v2561_v0  ;;  %597 = vmatprep.mubr.bf16.mxu1 %v2561_v0  ;;  %p2492_p3 = por %p2491_p13, %p2490_p10 }
  0x6a   : > { %p2486_p8 = pneg %p2485_p6 }
  0x6c   : > { %p2493_p7 = pnand %p2492_p3, %p2486_p8 }
  0x70   : > { %2263 = vmatmul.mubr.msk.bf16.gmra.mrb[8].mxu0 %vm407_vm0, %v2757_v21  ;;  %2271 = vmatmul.mubr.msk.bf16.gmra.mrb[8].mxu1 %vm407_vm0, %v2757_v21 }
  0x71   : > { %494 = vmatprep.mubr.bf16.mxu0 %v2561_v0  ;;  %607 = vmatprep.mubr.bf16.mxu1 %v2561_v0 }
  0x78   : > { %2264 = vmatmul.mubr.msk.bf16.gmra.mrb[12].mxu0 %vm407_vm0, %v2766_v22  ;;  %2272 = vmatmul.mubr.msk.bf16.gmra.mrb[12].mxu1 %vm407_vm0, %v2766_v22 }
  0x79   : > { %504 = vmatprep.mubr.bf16.mxu0 %v2561_v0  ;;  %617 = vmatprep.mubr.bf16.mxu1 %v2561_v0 }
  0x80   : > { %2265 = vmatmul.mubr.msk.bf16.gmra.mrb[16].mxu0 %vm407_vm0, %v2775_v23  ;;  %2273 = vmatmul.mubr.msk.bf16.gmra.mrb[16].mxu1 %vm407_vm0, %v2775_v23 }
  0x81   : > { %514 = vmatprep.mubr.bf16.mxu0 %v2561_v0  ;;  %627 = vmatprep.mubr.bf16.mxu1 %v2561_v0 }
  0x88   : > { %2266 = vmatmul.mubr.msk.bf16.gmra.mrb[20].mxu0 %vm407_vm0, %v2784_v24  ;;  %2274 = vmatmul.mubr.msk.bf16.gmra.mrb[20].mxu1 %vm407_vm0, %v2784_v24 }
  0x89   : > { %524 = vmatprep.mubr.bf16.mxu0 %v2561_v0  ;;  %637 = vmatprep.mubr.bf16.mxu1 %v2561_v0 }
  0x90   : > { %2267 = vmatmul.mubr.msk.bf16.gmra.mrb[24].mxu0 %vm407_vm0, %v2793_v25  ;;  %2275 = vmatmul.mubr.msk.bf16.gmra.mrb[24].mxu1 %vm407_vm0, %v2793_v25 }
  0x91   : > { %534 = vmatprep.mubr.bf16.mxu0 %v2561_v0  ;;  %647 = vmatprep.mubr.bf16.mxu1 %v2561_v0 }
  0x98   : > { %2268 = vmatmul.mubr.msk.bf16.gmra.mrb[28].mxu0 %vm407_vm0, %v2802_v26  ;;  %2276 = vmatmul.mubr.msk.bf16.gmra.mrb[28].mxu1 %vm407_vm0, %v2802_v26 }
  0x99   : > { %690 = vmatprep.mubr.bf16.mxu0 %v2561_v0  ;;  %803 = vmatprep.mubr.bf16.mxu1 %v2561_v0 }
  0xa0   : > { %2277 = vmatmul.mubr.msk.bf16.vlgmr.msra.gmra.mrb[32].mxu0 %vm407_vm0, %v2739_v9  ;;  %2285 = vmatmul.mubr.msk.bf16.vlgmr.msra.gmra.mrb[32].mxu1 %vm407_vm0, %v2739_v9 }
  0xa1   : > { %885 = vmatpush1.bf16.msra.mxu0 %v2413_v27  ;;  %700 = vmatprep.mubr.bf16.mxu0 %v2561_v0 }
  0xa2   : > { %886 = vmatprep.subr.bf16.mxu0 %v2421_v28  ;;  %998 = vmatpush1.bf16.msra.mxu1 %v2416_v29 }
  0xa3   : > { %813 = vmatprep.mubr.bf16.mxu1 %v2561_v0  ;;  %999 = vmatprep.subr.bf16.mxu1 %v2424_v30 }
  0xa5   : > { %887 = vmatpush1.bf16.msra.mxu0 %v2419_v31 }
  0xa6   : > { %1000 = vmatpush1.bf16.msra.mxu1 %v2422_v32 }
  0xa8   : > { %2278 = vmatmul.mubr.msk.bf16.gmra.mrb[36].mxu0 %vm407_vm0, %v2747_v14  ;;  %2286 = vmatmul.mubr.msk.bf16.gmra.mrb[36].mxu1 %vm407_vm0, %v2747_v14 }
  0xa9   : > { %710 = vmatprep.mubr.bf16.mxu0 %v2561_v0  ;;  %823 = vmatprep.mubr.bf16.mxu1 %v2561_v0 }
  0xb0   : > { %2279 = vmatmul.mubr.msk.bf16.gmra.mrb[40].mxu0 %vm407_vm0, %v2757_v21  ;;  %2287 = vmatmul.mubr.msk.bf16.gmra.mrb[40].mxu1 %vm407_vm0, %v2757_v21 }
  0xb1   : > { %720 = vmatprep.mubr.bf16.mxu0 %v2561_v0  ;;  %833 = vmatprep.mubr.bf16.mxu1 %v2561_v0 }
  0xb8   : > { %2280 = vmatmul.mubr.msk.bf16.gmra.mrb[44].mxu0 %vm407_vm0, %v2766_v22  ;;  %2288 = vmatmul.mubr.msk.bf16.gmra.mrb[44].mxu1 %vm407_vm0, %v2766_v22 }
  0xb9   : > { %730 = vmatprep.mubr.bf16.mxu0 %v2561_v0  ;;  %843 = vmatprep.mubr.bf16.mxu1 %v2561_v0 }
  0xc0   : > { %2281 = vmatmul.mubr.msk.bf16.gmra.mrb[48].mxu0 %vm407_vm0, %v2775_v23  ;;  %2289 = vmatmul.mubr.msk.bf16.gmra.mrb[48].mxu1 %vm407_vm0, %v2775_v23 }
  0xc1   : > { %740 = vmatprep.mubr.bf16.mxu0 %v2561_v0  ;;  %853 = vmatprep.mubr.bf16.mxu1 %v2561_v0 }
  0xc8   : > { %2282 = vmatmul.mubr.msk.bf16.gmra.mrb[52].mxu0 %vm407_vm0, %v2784_v24  ;;  %2290 = vmatmul.mubr.msk.bf16.gmra.mrb[52].mxu1 %vm407_vm0, %v2784_v24 }
  0xc9   : > { %750 = vmatprep.mubr.bf16.mxu0 %v2561_v0  ;;  %863 = vmatprep.mubr.bf16.mxu1 %v2561_v0 }
  0xd0   : > { %2283 = vmatmul.mubr.msk.bf16.gmra.mrb[56].mxu0 %vm407_vm0, %v2793_v25  ;;  %2291 = vmatmul.mubr.msk.bf16.gmra.mrb[56].mxu1 %vm407_vm0, %v2793_v25 }
  0xd1   : > { %760 = vmatprep.mubr.bf16.mxu0 %v2561_v0  ;;  %873 = vmatprep.mubr.bf16.mxu1 %v2561_v0 }
  0xd8   : > { %2284 = vmatmul.mubr.msk.bf16.gmra.mrb[60].mxu0 %vm407_vm0, %v2802_v26  ;;  %2292 = vmatmul.mubr.msk.bf16.gmra.mrb[60].mxu1 %vm407_vm0, %v2802_v26 }
  0xd9   : > { %916 = vmatprep.mubr.bf16.mxu0 %v2561_v0  ;;  %1029 = vmatprep.mubr.bf16.mxu1 %v2561_v0 }
  0xe0   : > { %2293 = vmatmul.mubr.msk.bf16.vlgmr.msra.gmra.mrb[64].mxu0 %vm407_vm0, %v2739_v9  ;;  %2301 = vmatmul.mubr.msk.bf16.vlgmr.msra.gmra.mrb[64].mxu1 %vm407_vm0, %v2739_v9 }
  0xe1   : > { %926 = vmatprep.mubr.bf16.mxu0 %v2561_v0  ;;  %1039 = vmatprep.mubr.bf16.mxu1 %v2561_v0 }
  0xe8   : > { %2294 = vmatmul.mubr.msk.bf16.gmra.mrb[68].mxu0 %vm407_vm0, %v2747_v14  ;;  %2302 = vmatmul.mubr.msk.bf16.gmra.mrb[68].mxu1 %vm407_vm0, %v2747_v14 }
  0xe9   : > { %936 = vmatprep.mubr.bf16.mxu0 %v2561_v0  ;;  %1049 = vmatprep.mubr.bf16.mxu1 %v2561_v0 }
  0xf0   : > { %2295 = vmatmul.mubr.msk.bf16.gmra.mrb[72].mxu0 %vm407_vm0, %v2757_v21  ;;  %2303 = vmatmul.mubr.msk.bf16.gmra.mrb[72].mxu1 %vm407_vm0, %v2757_v21 }
  0xf1   : > { %946 = vmatprep.mubr.bf16.mxu0 %v2561_v0  ;;  %1059 = vmatprep.mubr.bf16.mxu1 %v2561_v0 }
  0xf8   : > { %2296 = vmatmul.mubr.msk.bf16.gmra.mrb[76].mxu0 %vm407_vm0, %v2766_v22  ;;  %2304 = vmatmul.mubr.msk.bf16.gmra.mrb[76].mxu1 %vm407_vm0, %v2766_v22 }
  0xf9   : > { %956 = vmatprep.mubr.bf16.mxu0 %v2561_v0  ;;  %1069 = vmatprep.mubr.bf16.mxu1 %v2561_v0 }
 0x100   : > { %2297 = vmatmul.mubr.msk.bf16.gmra.mrb[80].mxu0 %vm407_vm0, %v2775_v23  ;;  %2305 = vmatmul.mubr.msk.bf16.gmra.mrb[80].mxu1 %vm407_vm0, %v2775_v23 }
 0x101   : > { %966 = vmatprep.mubr.bf16.mxu0 %v2561_v0  ;;  %1079 = vmatprep.mubr.bf16.mxu1 %v2561_v0 }
 0x108   : > { %2298 = vmatmul.mubr.msk.bf16.gmra.mrb[84].mxu0 %vm407_vm0, %v2784_v24  ;;  %2306 = vmatmul.mubr.msk.bf16.gmra.mrb[84].mxu1 %vm407_vm0, %v2784_v24 }
 0x109   : > { %976 = vmatprep.mubr.bf16.mxu0 %v2561_v0  ;;  %1089 = vmatprep.mubr.bf16.mxu1 %v2561_v0 }
 0x110   : > { %2299 = vmatmul.mubr.msk.bf16.gmra.mrb[88].mxu0 %vm407_vm0, %v2793_v25  ;;  %2307 = vmatmul.mubr.msk.bf16.gmra.mrb[88].mxu1 %vm407_vm0, %v2793_v25 }
 0x111   : > { %986 = vmatprep.mubr.bf16.mxu0 %v2561_v0  ;;  %1099 = vmatprep.mubr.bf16.mxu1 %v2561_v0 }
 0x118   : > { %2300 = vmatmul.mubr.msk.bf16.gmra.mrb[92].mxu0 %vm407_vm0, %v2802_v26  ;;  %2308 = vmatmul.mubr.msk.bf16.gmra.mrb[92].mxu1 %vm407_vm0, %v2802_v26 }
 0x133   : > { %v466_v33 = vpop.f32.mrb[0].mxu0  ;;  %v579_v37 = vpop.f32.mrb[0].mxu1 }
 0x134   : > { %v468_v34 = vpop.f32.mrb[1].mxu0  ;;  %v1221_v39 = vrot.slane %v579_v37, 2  ;;  %v2910_v41 = vpop.f32.mrb[1].mxu1  ;;  %v1115_v45 = vadd.f32 %v2907_v35, %v466_v33 }
 0x135   : > { %v470_v36 = vpop.f32.mrb[2].mxu0  ;;  %v1148_v42 = vrot.slane %v468_v34, 1  ;;  %v583_v44 = vpop.f32.mrb[2].mxu1 }
 0x136   : > { %v1116_v38 = vadd.f32 %v2907_v35, %v470_v36  ;;  %v472_v40 = vpop.f32.mrb[3].mxu0  ;;  %v1222_v46 = vrot.slane %v583_v44, 2  ;;  %v2913_v47 = vpop.f32.mrb[3].mxu1 }
 0x137   : > { %v1149_v43 = vrot.slane %v472_v40, 1 }
 0x138   : > { %v1223_v51 = vsel %vm1220_vm2, %v1221_v39, %v1222_v46 }
 0x139   : > { %v1150_v48 = vsel %vm1147_vm1, %v1148_v42, %v1149_v43  ;;  %v1189_v49 = vadd.f32 %v1149_v43, %v1116_v38 }
 0x13a   : > { %v1188_v50 = vadd.f32 %v1150_v48, %v1115_v45 }
 0x13b   : > { %v1262_v52 = vadd.f32 %v1222_v46, %v1189_v49  ;;  %v476_v53 = vpop.f32.mrb[4].mxu0  ;;  %v589_v58 = vpop.f32.mrb[4].mxu1 }
 0x13c   : > { %v1261_v54 = vadd.f32 %v1223_v51, %v1188_v50  ;;  %v478_v55 = vpop.f32.mrb[5].mxu0  ;;  %v1224_v61 = vrot.slane %v589_v58, 2  ;;  %v2918_v63 = vpop.f32.mrb[5].mxu1  ;;  %v1117_v5 = vadd.f32 %v2907_v35, %v476_v53 }
 0x13d   : > { %v1278_v56 = vmax.f32 %v1262_v52, 0.0  ;;  %v480_v57 = vpop.f32.mrb[6].mxu0  ;;  %v1151_v1 = vrot.slane %v478_v55, 1  ;;  %v593_v3 = vpop.f32.mrb[6].mxu1 }
 0x13e   : > { %v1277_v59 = vmax.f32 %v1261_v54, 0.0  ;;  %v1118_v60 = vadd.f32 %v2907_v35, %v480_v57  ;;  %v482_v62 = vpop.f32.mrb[7].mxu0  ;;  %v1225_v6 = vrot.slane %v593_v3, 2  ;;  %v2922_v7 = vpop.f32.mrb[7].mxu1 }
 0x13f   : > { %v1293_v0 = vsel %vm1220_vm2, %v1278_v56, -inf  ;;  %v1152_v2 = vrot.slane %v482_v62, 1 }
 0x140   : > { %v1294_v4 = vmax.f32 %v1277_v59, %v1293_v0  ;;  %v1226_v12 = vsel %vm1220_vm2, %v1224_v61, %v1225_v6 }
 0x141   : > { %v1153_v8 = vsel %vm1147_vm1, %v1151_v1, %v1152_v2  ;;  %v1191_v9 = vadd.f32 %v1152_v2, %v1118_v60 }
 0x142   : > { %v1295_v10 = vrot.slane %v1294_v4, 4  ;;  %v1190_v11 = vadd.f32 %v1153_v8, %v1117_v5 }
 0x143   : > { %v1264_v13 = vadd.f32 %v1225_v6, %v1191_v9  ;;  %v486_v14 = vpop.f32.mrb[8].mxu0  ;;  %v599_v20 = vpop.f32.mrb[8].mxu1 }
 0x144   : > { %v1296_v15 = vmax.f32 %v1294_v4, %v1295_v10  ;;  %v1263_v16 = vadd.f32 %v1226_v12, %v1190_v11  ;;  %v488_v17 = vpop.f32.mrb[9].mxu0  ;;  %v1227_v23 = vrot.slane %v599_v20, 2  ;;  %v2927_v25 = vpop.f32.mrb[9].mxu1  ;;  %v1119_v32 = vadd.f32 %v2907_v35, %v486_v14 }
 0x145   : > { %v1280_v18 = vmax.f32 %v1264_v13, 0.0  ;;  %v490_v19 = vpop.f32.mrb[10].mxu0  ;;  %v1154_v28 = vrot.slane %v488_v17, 1  ;;  %v603_v30 = vpop.f32.mrb[10].mxu1 }
 0x146   : > { %v1279_v21 = vmax.f32 %v1263_v16, 0.0  ;;  %v1120_v22 = vadd.f32 %v2907_v35, %v490_v19  ;;  %v492_v24 = vpop.f32.mrb[11].mxu0  ;;  %v1297_v26 = vrot.slane %v1296_v15, 2  ;;  %v1228_v33 = vrot.slane %v603_v30, 2  ;;  %v2931_v34 = vpop.f32.mrb[11].mxu1 }
 0x147   : > { %v1301_v27 = vsel %vm1220_vm2, %v1280_v18, -inf  ;;  %v1155_v29 = vrot.slane %v492_v24, 1 }
 0x148   : > { %v1302_v31 = vmax.f32 %v1279_v21, %v1301_v27  ;;  %v1229_v40 = vsel %vm1220_vm2, %v1227_v23, %v1228_v33  ;;  %v1298_v42 = vmax.f32 %v1296_v15, %v1297_v26 }
 0x149   : > { %v1156_v36 = vsel %vm1147_vm1, %v1154_v28, %v1155_v29  ;;  %v1193_v37 = vadd.f32 %v1155_v29, %v1120_v22 }
 0x14a   : > { %v1303_v38 = vrot.slane %v1302_v31, 4  ;;  %v1192_v39 = vadd.f32 %v1156_v36, %v1119_v32  ;;  %v1299_v58 = vrot.slane %v1298_v42, 1 }
 0x14b   : > { %v1266_v43 = vadd.f32 %v1228_v33, %v1193_v37  ;;  %v496_v44 = vpop.f32.mrb[12].mxu0  ;;  %v609_v51 = vpop.f32.mrb[12].mxu1 }
 0x14c   : > { %v1304_v45 = vmax.f32 %v1302_v31, %v1303_v38  ;;  %v1265_v46 = vadd.f32 %v1229_v40, %v1192_v39  ;;  %v498_v48 = vpop.f32.mrb[13].mxu0  ;;  %v1230_v55 = vrot.slane %v609_v51, 2  ;;  %v2936_v57 = vpop.f32.mrb[13].mxu1  ;;  %v1121_v2 = vadd.f32 %v2907_v35, %v496_v44 }
 0x14d   : > { %v1282_v49 = vmax.f32 %v1266_v43, 0.0  ;;  %v500_v50 = vpop.f32.mrb[14].mxu0  ;;  %v1157_v60 = vrot.slane %v498_v48, 1  ;;  %v613_v62 = vpop.f32.mrb[14].mxu1  ;;  %v1300_v14 = vmax.f32 %v1298_v42, %v1299_v58 }
 0x14e   : > { %v1305_v52 = vrot.slane %v1304_v45, 2  ;;  %v1281_v53 = vmax.f32 %v1265_v46, 0.0  ;;  %v1122_v54 = vadd.f32 %v2907_v35, %v500_v50  ;;  %v502_v56 = vpop.f32.mrb[15].mxu0  ;;  %v1231_v3 = vrot.slane %v613_v62, 2  ;;  %v2940_v4 = vpop.f32.mrb[15].mxu1 }
 0x14f   : > { %v1309_v59 = vsel %vm1220_vm2, %v1282_v49, -inf  ;;  %v1158_v61 = vrot.slane %v502_v56, 1 }
 0x150   : > { %v1306_v0 = vmax.f32 %v1304_v45, %v1305_v52  ;;  %v1310_v1 = vmax.f32 %v1281_v53, %v1309_v59  ;;  %v1232_v11 = vsel %vm1220_vm2, %v1230_v55, %v1231_v3 }
 0x151   : > { %v1159_v5 = vsel %vm1147_vm1, %v1157_v60, %v1158_v61  ;;  %v1195_v6 = vadd.f32 %v1158_v61, %v1122_v54 }
 0x152   : > { %v1307_v8 = vrot.slane %v1306_v0, 1  ;;  %v1311_v9 = vrot.slane %v1310_v1, 4  ;;  %v1194_v10 = vadd.f32 %v1159_v5, %v1121_v2 }
 0x153   : > { %v1268_v12 = vadd.f32 %v1231_v3, %v1195_v6  ;;  %v506_v13 = vpop.f32.mrb[16].mxu0  ;;  %v619_v21 = vpop.f32.mrb[16].mxu1 }
 0x154   : > { %v1308_v15 = vmax.f32 %v1306_v0, %v1307_v8  ;;  %v1312_v16 = vmax.f32 %v1310_v1, %v1311_v9  ;;  %v1267_v17 = vadd.f32 %v1232_v11, %v1194_v10  ;;  %v508_v18 = vpop.f32.mrb[17].mxu0  ;;  %v2946_v28 = vpop.f32.mrb[17].mxu1  ;;  %v1233_v31 = vrot.slane %v619_v21, 2 }
 0x155   : > { %v1284_v19 = vmax.f32 %v1268_v12, 0.0  ;;  %v510_v20 = vpop.f32.mrb[18].mxu0  ;;  %v1160_v30 = vrot.slane %v508_v18, 1  ;;  %v623_v33 = vpop.f32.mrb[18].mxu1  ;;  %v1123_v38 = vadd.f32 %v2907_v35, %v506_v13 }
 0x156   : > { %v1366_v22 = vsel %vm1365_vm3, %v1308_v15, %v1300_v14  ;;  %v1313_v23 = vrot.slane %v1312_v16, 2  ;;  %v1283_v24 = vmax.f32 %v1267_v17, 0.0  ;;  %v1124_v26 = vadd.f32 %v2907_v35, %v510_v20  ;;  %v512_v27 = vpop.f32.mrb[19].mxu0  ;;  %v2950_v40 = vpop.f32.mrb[19].mxu1 }
 0x157   : > { %v1317_v29 = vsel %vm1220_vm2, %v1284_v19, -inf  ;;  %v1161_v32 = vrot.slane %v512_v27, 1  ;;  %v1234_v39 = vrot.slane %v623_v33, 2 }
 0x158   : > { %v1314_v36 = vmax.f32 %v1312_v16, %v1313_v23  ;;  %v1318_v37 = vmax.f32 %v1283_v24, %v1317_v29 }
 0x159   : > { %v1162_v42 = vsel %vm1147_vm1, %v1160_v30, %v1161_v32  ;;  %v1197_v43 = vadd.f32 %v1161_v32, %v1124_v26  ;;  %v1235_v48 = vsel %vm1220_vm2, %v1233_v31, %v1234_v39 }
 0x15a   : > { %v1315_v44 = vrot.slane %v1314_v36, 1  ;;  %v1319_v45 = vrot.slane %v1318_v37, 4  ;;  %v1196_v46 = vadd.f32 %v1162_v42, %v1123_v38 }
 0x15b   : > { %v1270_v49 = vadd.f32 %v1234_v39, %v1197_v43  ;;  %v516_v50 = vpop.f32.mrb[20].mxu0  ;;  %v629_v58 = vpop.f32.mrb[20].mxu1 }
 0x15c   : > { %v1316_v51 = vmax.f32 %v1314_v36, %v1315_v44  ;;  %v1320_v52 = vmax.f32 %v1318_v37, %v1319_v45  ;;  %v1269_v53 = vadd.f32 %v1235_v48, %v1196_v46  ;;  %v518_v54 = vpop.f32.mrb[21].mxu0  ;;  %v2956_v1 = vpop.f32.mrb[21].mxu1  ;;  %v1236_v5 = vrot.slane %v629_v58, 2 }
 0x15d   : > { %v1286_v55 = vmax.f32 %v1270_v49, 0.0  ;;  %v520_v56 = vpop.f32.mrb[22].mxu0  ;;  %v1163_v3 = vrot.slane %v518_v54, 1  ;;  %v633_v8 = vpop.f32.mrb[22].mxu1  ;;  %v1125_v11 = vadd.f32 %v2907_v35, %v516_v50 }
 0x15e   : > { %v1368_v59 = vsel %vm1367_vm4, %v1316_v51, %v1366_v22  ;;  %v1321_v60 = vrot.slane %v1320_v52, 2  ;;  %v1285_v61 = vmax.f32 %v1269_v53, 0.0  ;;  %v1126_v62 = vadd.f32 %v2907_v35, %v520_v56  ;;  %v522_v0 = vpop.f32.mrb[23].mxu0  ;;  %v2960_v13 = vpop.f32.mrb[23].mxu1 }
 0x15f   : > { %v1325_v2 = vsel %vm1220_vm2, %v1286_v55, -inf  ;;  %v1164_v6 = vrot.slane %v522_v0, 1  ;;  %v1237_v12 = vrot.slane %v633_v8, 2 }
 0x160   : > { %v1322_v9 = vmax.f32 %v1320_v52, %v1321_v60  ;;  %v1326_v10 = vmax.f32 %v1285_v61, %v1325_v2 }
 0x161   : > { %v1165_v14 = vsel %vm1147_vm1, %v1163_v3, %v1164_v6  ;;  %v1199_v15 = vadd.f32 %v1164_v6, %v1126_v62  ;;  %v1238_v19 = vsel %vm1220_vm2, %v1236_v5, %v1237_v12 }
 0x162   : > { %v1323_v16 = vrot.slane %v1322_v9, 1  ;;  %v1327_v17 = vrot.slane %v1326_v10, 4  ;;  %v1198_v18 = vadd.f32 %v1165_v14, %v1125_v11 }
 0x163   : > { %v1272_v20 = vadd.f32 %v1237_v12, %v1199_v15  ;;  %v526_v21 = vpop.f32.mrb[24].mxu0  ;;  %v639_v30 = vpop.f32.mrb[24].mxu1 }
 0x164   : > { %v1324_v22 = vmax.f32 %v1322_v9, %v1323_v16  ;;  %v1328_v23 = vmax.f32 %v1326_v10, %v1327_v17  ;;  %v1271_v24 = vadd.f32 %v1238_v19, %v1198_v18  ;;  %v528_v26 = vpop.f32.mrb[25].mxu0  ;;  %v2966_v38 = vpop.f32.mrb[25].mxu1  ;;  %v1239_v43 = vrot.slane %v639_v30, 2 }
 0x165   : > { %v1288_v27 = vmax.f32 %v1272_v20, 0.0  ;;  %v530_v29 = vpop.f32.mrb[26].mxu0  ;;  %v1166_v42 = vrot.slane %v528_v26, 1  ;;  %v643_v45 = vpop.f32.mrb[26].mxu1  ;;  %v1127_v49 = vadd.f32 %v2907_v35, %v526_v21 }
 0x166   : > { %v1370_v31 = vsel %vm1369_vm5, %v1324_v22, %v1368_v59  ;;  %v1329_v32 = vrot.slane %v1328_v23, 2  ;;  %v1287_v33 = vmax.f32 %v1271_v24, 0.0  ;;  %v1128_v36 = vadd.f32 %v2907_v35, %v530_v29  ;;  %v532_v37 = vpop.f32.mrb[27].mxu0  ;;  %v2970_v51 = vpop.f32.mrb[27].mxu1  ;;  %v2986_v29 = vld [vmem:[%s3281_s2 + $0x1] ss:$0 sm:$0xff] }
 0x167   : > { %v1333_v39 = vsel %vm1220_vm2, %v1288_v27, -inf  ;;  %v1167_v44 = vrot.slane %v532_v37, 1  ;;  %v1240_v50 = vrot.slane %v643_v45, 2  ;;  %v1387_v45 = vadd.f32 %v2986_v29, %v2913_v47 }
 0x168   : > { %v1330_v46 = vmax.f32 %v1328_v23, %v1329_v32  ;;  %v1334_v48 = vmax.f32 %v1287_v33, %v1333_v39 }
 0x169   : > { %v1168_v52 = vsel %vm1147_vm1, %v1166_v42, %v1167_v44  ;;  %v1201_v53 = vadd.f32 %v1167_v44, %v1128_v36  ;;  %v1241_v58 = vsel %vm1220_vm2, %v1239_v43, %v1240_v50  ;;  %v1386_v44 = vadd.f32 %v2986_v29, %v2910_v41 }
 0x16a   : > { %v1331_v54 = vrot.slane %v1330_v46, 1  ;;  %v1335_v55 = vrot.slane %v1334_v48, 4  ;;  %v1200_v56 = vadd.f32 %v1168_v52, %v1127_v49 }
 0x16b   : > { %v1274_v59 = vadd.f32 %v1240_v50, %v1201_v53  ;;  %v536_v60 = vpop.f32.mrb[28].mxu0  ;;  %v649_v6 = vpop.f32.mrb[28].mxu1 }
 0x16c   : > { %v1332_v61 = vmax.f32 %v1330_v46, %v1331_v54  ;;  %v1336_v62 = vmax.f32 %v1334_v48, %v1335_v55  ;;  %v1273_v0 = vadd.f32 %v1241_v58, %v1200_v56  ;;  %v538_v2 = vpop.f32.mrb[29].mxu0  ;;  %v2976_v14 = vpop.f32.mrb[29].mxu1  ;;  %v1242_v17 = vrot.slane %v649_v6, 2 }
 0x16d   : > { %v1290_v3 = vmax.f32 %v1274_v59, 0.0  ;;  %v540_v5 = vpop.f32.mrb[30].mxu0  ;;  %v1169_v16 = vrot.slane %v538_v2, 1  ;;  %v653_v19 = vpop.f32.mrb[30].mxu1  ;;  %v1129_v22 = vadd.f32 %v2907_v35, %v536_v60 }
 0x16e   : > { %v1372_v8 = vsel %vm1371_vm6, %v1332_v61, %v1370_v31  ;;  %v1337_v9 = vrot.slane %v1336_v62, 2  ;;  %v1289_v10 = vmax.f32 %v1273_v0, 0.0  ;;  %v1130_v11 = vadd.f32 %v2907_v35, %v540_v5  ;;  %v542_v12 = vpop.f32.mrb[31].mxu0  ;;  %v2980_v24 = vpop.f32.mrb[31].mxu1 }
 0x16f   : > { %v1341_v15 = vsel %vm1220_vm2, %v1290_v3, -inf  ;;  %v1170_v18 = vrot.slane %v542_v12, 1  ;;  %v1243_v23 = vrot.slane %v653_v19, 2 }
 0x170   : > { %v1338_v20 = vmax.f32 %v1336_v62, %v1337_v9  ;;  %v1342_v21 = vmax.f32 %v1289_v10, %v1341_v15 }
 0x171   : > { %v1171_v26 = vsel %vm1147_vm1, %v1169_v16, %v1170_v18  ;;  %v1203_v27 = vadd.f32 %v1170_v18, %v1130_v11  ;;  %v1244_v33 = vsel %vm1220_vm2, %v1242_v17, %v1243_v23 }
 0x172   : > { %v1339_v30 = vrot.slane %v1338_v20, 1  ;;  %v1343_v31 = vrot.slane %v1342_v21, 4  ;;  %v1202_v32 = vadd.f32 %v1171_v26, %v1129_v22  ;;  %v1388_v22 = vadd.f32 %v2986_v29, %v2918_v63 }
 0x173   : > { %v1276_v36 = vadd.f32 %v1243_v23, %v1203_v27  ;;  %v692_v37 = vpop.f32.mrb[32].mxu0  ;;  %v805_v50 = vpop.f32.mrb[32].mxu1  ;;  %v1389_v23 = vadd.f32 %v2986_v29, %v2922_v7 }
 0x174   : > { %v1340_v35 = vmax.f32 %v1338_v20, %v1339_v30  ;;  %v1344_v39 = vmax.f32 %v1342_v21, %v1343_v31  ;;  %v1275_v42 = vadd.f32 %v1244_v33, %v1202_v32  ;;  %v694_v43 = vpop.f32.mrb[33].mxu0  ;;  %v1418_v48 = vrot.slane %v692_v37, 1  ;;  %v2994_v58 = vpop.f32.mrb[33].mxu1 }
 0x175   : > { %v1292_v46 = vmax.f32 %v1276_v36, 0.0  ;;  %v696_v49 = vpop.f32.mrb[34].mxu0  ;;  %v1490_v60 = vrot.slane %v694_v43, 2  ;;  %v1563_v61 = vrot.slane %v805_v50, 3  ;;  %v809_v62 = vpop.f32.mrb[34].mxu1 }
 0x176   : > { %v1374_v52 = vsel %vm1373_vm7, %v1340_v35, %v1372_v8  ;;  %v1345_v53 = vrot.slane %v1344_v39, 2  ;;  %v1291_v54 = vmax.f32 %v1275_v42, 0.0  ;;  %v1419_v55 = vrot.slane %v696_v49, 1  ;;  %v698_v56 = vpop.f32.mrb[35].mxu0  ;;  %v2998_v5 = vpop.f32.mrb[35].mxu1 }
 0x177   : > { %v1349_v59 = vsel %vm1220_vm2, %v1292_v46, -inf  ;;  %v1491_v41 = vrot.slane %v698_v56, 2  ;;  %v1564_v9 = vrot.slane %v809_v62, 3 }
 0x178   : > { %v1346_v0 = vmax.f32 %v1344_v39, %v1345_v53  ;;  %v1350_v47 = vmax.f32 %v1291_v54, %v1349_v59  ;;  %v1420_v2 = vsel %vm1147_vm1, %v1418_v48, %v1419_v55  ;;  %v1459_v3 = vadd.f32 %v1419_v55, %v1387_v45 }
 0x179   : > { %v1458_v6 = vadd.f32 %v1420_v2, %v1386_v44  ;;  %v1492_v8 = vsel %vm1220_vm2, %v1490_v60, %v1491_v41  ;;  %v1565_v16 = vsel %vm1562_vm8, %v1563_v61, %v1564_v9 }
 0x17a   : > { %v1347_v10 = vrot.slane %v1346_v0, 1  ;;  %v1351_v11 = vrot.slane %v1350_v47, 4  ;;  %v1531_v12 = vadd.f32 %v1491_v41, %v1459_v3 }
 0x17b   : > { %v1530_v15 = vadd.f32 %v1492_v8, %v1458_v6  ;;  %v702_v17 = vpop.f32.mrb[36].mxu0  ;;  %v815_v31 = vpop.f32.mrb[36].mxu1  ;;  %v1391_v6 = vadd.f32 %v2986_v29, %v2931_v34 }
 0x17c   : > { %v1348_v18 = vmax.f32 %v1346_v0, %v1347_v10  ;;  %v1352_v19 = vmax.f32 %v1350_v47, %v1351_v11  ;;  %v1604_v20 = vadd.f32 %v1564_v9, %v1531_v12  ;;  %v704_v21 = vpop.f32.mrb[37].mxu0  ;;  %v1421_v27 = vrot.slane %v702_v17, 1  ;;  %v3006_v39 = vpop.f32.mrb[37].mxu1 }
 0x17d   : > { %v1603_v26 = vadd.f32 %v1565_v16, %v1530_v15  ;;  %v706_v30 = vpop.f32.mrb[38].mxu0  ;;  %v1493_v36 = vrot.slane %v704_v21, 2  ;;  %v1566_v43 = vrot.slane %v815_v31, 3  ;;  %v819_v45 = vpop.f32.mrb[38].mxu1  ;;  %v1390_v0 = vadd.f32 %v2986_v29, %v2927_v25 }
 0x17e   : > { %v1353_v32 = vrot.slane %v1352_v19, 2  ;;  %v1620_v33 = vmax.f32 %v1604_v20, 0.0  ;;  %v1422_v37 = vrot.slane %v706_v30, 1  ;;  %v708_v35 = vpop.f32.mrb[39].mxu0  ;;  %v1376_v63 = vsel %vm1375_vm9, %v1348_v18, %v1374_v52  ;;  %v3011_v50 = vpop.f32.mrb[39].mxu1 }
 0x17f   : > { %v1619_v42 = vmax.f32 %v1603_v26, 0.0  ;;  %v1494_v44 = vrot.slane %v708_v35, 2  ;;  %v1567_v56 = vrot.slane %v819_v45, 3 }
 0x180   : > { %v1354_v46 = vmax.f32 %v1352_v19, %v1353_v32  ;;  %v1635_v7 = vsel %vm1562_vm8, %v1620_v33, -inf  ;;  %v1423_v48 = vsel %vm1147_vm1, %v1421_v27, %v1422_v37  ;;  %v1461_v49 = vadd.f32 %v1422_v37, %v1389_v23 }
 0x181   : > { %v1636_v53 = vmax.f32 %v1619_v42, %v1635_v7  ;;  %v1460_v54 = vadd.f32 %v1423_v48, %v1388_v22  ;;  %v1495_v55 = vsel %vm1220_vm2, %v1493_v36, %v1494_v44  ;;  %v1568_v52 = vsel %vm1562_vm8, %v1566_v43, %v1567_v56 }
 0x182   : > { %v1355_v59 = vrot.slane %v1354_v46, 1  ;;  %v1533_v60 = vadd.f32 %v1494_v44, %v1461_v49  ;;  %v1393_v49 = vadd.f32 %v2986_v29, %v2940_v4 }
 0x183   : > { %v1637_v61 = vrot.slane %v1636_v53, 4  ;;  %v1532_v41 = vadd.f32 %v1495_v55, %v1460_v54  ;;  %v712_v62 = vpop.f32.mrb[40].mxu0  ;;  %v825_v12 = vpop.f32.mrb[40].mxu1 }
 0x184   : > { %v1356_v47 = vmax.f32 %v1354_v46, %v1355_v59  ;;  %v1606_v2 = vadd.f32 %v1567_v56, %v1533_v60  ;;  %v714_v3 = vpop.f32.mrb[41].mxu0  ;;  %v1424_v10 = vrot.slane %v712_v62, 1  ;;  %v1569_v17 = vrot.slane %v825_v12, 3  ;;  %v3020_v19 = vpop.f32.mrb[41].mxu1 }
 0x185   : > { %v1638_v8 = vmax.f32 %v1636_v53, %v1637_v61  ;;  %v1605_v9 = vadd.f32 %v1568_v52, %v1532_v41  ;;  %v716_v11 = vpop.f32.mrb[42].mxu0  ;;  %v1496_v22 = vrot.slane %v714_v3, 2  ;;  %v829_v26 = vpop.f32.mrb[42].mxu1  ;;  %v1392_v46 = vadd.f32 %v2986_v29, %v2936_v57 }
 0x186   : > { %v1622_v15 = vmax.f32 %v1606_v2, 0.0  ;;  %v1425_v16 = vrot.slane %v716_v11, 1  ;;  %v718_v18 = vpop.f32.mrb[43].mxu0  ;;  %v1378_v25 = vsel %vm1377_vm10, %v1356_v47, %v1376_v63  ;;  %v1570_v31 = vrot.slane %v829_v26, 3  ;;  %v3030_v32 = vpop.f32.mrb[43].mxu1 }
 0x187   : > { %v1639_v20 = vrot.slane %v1638_v8, 2  ;;  %v1621_v21 = vmax.f32 %v1605_v9, 0.0  ;;  %v1497_v23 = vrot.slane %v718_v18, 2  ;;  %1380 = vst [vmem:[%s3025_s5] sm:$0xff] %v1378_v25  ;;  %v1394_v26 = vadd.f32 %v2986_v29, %v2946_v28 }
 0x188   : > { %v1643_v34 = vsel %vm1562_vm8, %v1622_v15, -inf  ;;  %v1426_v27 = vsel %vm1147_vm1, %v1424_v10, %v1425_v16  ;;  %v1463_v30 = vadd.f32 %v1425_v16, %v1391_v6  ;;  %v1571_v43 = vsel %vm1562_vm8, %v1569_v17, %v1570_v31 }
 0x189   : > { %v1640_v33 = vmax.f32 %v1638_v8, %v1639_v20  ;;  %v1644_v36 = vmax.f32 %v1621_v21, %v1643_v34  ;;  %v1462_v37 = vadd.f32 %v1426_v27, %v1390_v0  ;;  %v1498_v35 = vsel %vm1220_vm2, %v1496_v22, %v1497_v23 }
 0x18a   : > { %v1535_v42 = vadd.f32 %v1497_v23, %v1463_v30  ;;  %v1395_v34 = vadd.f32 %v2986_v29, %v2950_v40 }
 0x18b   : > { %v1645_v44 = vrot.slane %v1644_v36, 4  ;;  %v1534_v45 = vadd.f32 %v1498_v35, %v1462_v37  ;;  %v722_v63 = vpop.f32.mrb[44].mxu0  ;;  %v1641_v53 = vrot.slane %v1640_v33, 1  ;;  %v835_v59 = vpop.f32.mrb[44].mxu1 }
 0x18c   : > { %v1608_v7 = vadd.f32 %v1570_v31, %v1535_v42  ;;  %v724_v48 = vpop.f32.mrb[45].mxu0  ;;  %v1427_v61 = vrot.slane %v722_v63, 1  ;;  %v1572_v52 = vrot.slane %v835_v59, 3  ;;  %v3038_v0 = vpop.f32.mrb[45].mxu1 }
 0x18d   : > { %v1646_v54 = vmax.f32 %v1644_v36, %v1645_v44  ;;  %v1607_v55 = vadd.f32 %v1571_v43, %v1534_v45  ;;  %v726_v56 = vpop.f32.mrb[46].mxu0  ;;  %v1499_v57 = vrot.slane %v724_v48, 2  ;;  %v839_v6 = vpop.f32.mrb[46].mxu1  ;;  %v1642_v31 = vmax.f32 %v1640_v33, %v1641_v53 }
 0x18e   : > { %v1624_v60 = vmax.f32 %v1608_v7, 0.0  ;;  %v1428_v41 = vrot.slane %v726_v56, 1  ;;  %v728_v62 = vpop.f32.mrb[47].mxu0  ;;  %v1573_v10 = vrot.slane %v839_v6, 3  ;;  %v3042_v11 = vpop.f32.mrb[47].mxu1 }
 0x18f   : > { %v1647_v47 = vrot.slane %v1646_v54, 2  ;;  %v1623_v2 = vmax.f32 %v1607_v55, 0.0  ;;  %v1500_v3 = vrot.slane %v728_v62, 2 }
 0x190   : > { %v1651_v8 = vsel %vm1562_vm8, %v1624_v60, -inf  ;;  %v1429_v4 = vsel %vm1147_vm1, %v1427_v61, %v1428_v41  ;;  %v1465_v9 = vadd.f32 %v1428_v41, %v1393_v49  ;;  %v1574_v25 = vsel %vm1562_vm8, %v1572_v52, %v1573_v10 }
 0x191   : > { %v1648_v12 = vmax.f32 %v1646_v54, %v1647_v47  ;;  %v1652_v15 = vmax.f32 %v1623_v2, %v1651_v8  ;;  %v1464_v16 = vadd.f32 %v1429_v4, %v1392_v46  ;;  %v1501_v17 = vsel %vm1220_vm2, %v1499_v57, %v1500_v3 }
 0x192   : > { %v1537_v18 = vadd.f32 %v1500_v3, %v1465_v9  ;;  %v1396_v4 = vadd.f32 %v2986_v29, %v2956_v1 }
 0x193   : > { %v1649_v20 = vrot.slane %v1648_v12, 1  ;;  %v1653_v21 = vrot.slane %v1652_v15, 4  ;;  %v1536_v22 = vadd.f32 %v1501_v17, %v1464_v16  ;;  %v732_v23 = vpop.f32.mrb[48].mxu0  ;;  %v845_v43 = vpop.f32.mrb[48].mxu1 }
 0x194   : > { %v1610_v27 = vadd.f32 %v1573_v10, %v1537_v18  ;;  %v734_v30 = vpop.f32.mrb[49].mxu0  ;;  %v1430_v45 = vrot.slane %v732_v23, 1  ;;  %v3050_v48 = vpop.f32.mrb[49].mxu1  ;;  %v1575_v59 = vrot.slane %v845_v43, 3 }
 0x195   : > { %v1650_v36 = vmax.f32 %v1648_v12, %v1649_v20  ;;  %v1654_v37 = vmax.f32 %v1652_v15, %v1653_v21  ;;  %v1609_v35 = vadd.f32 %v1574_v25, %v1536_v22  ;;  %v736_v42 = vpop.f32.mrb[50].mxu0  ;;  %v1502_v63 = vrot.slane %v734_v30, 2  ;;  %v849_v55 = vpop.f32.mrb[50].mxu1 }
 0x196   : > { %v1626_v44 = vmax.f32 %v1610_v27, 0.0  ;;  %v1431_v46 = vrot.slane %v736_v42, 1  ;;  %v738_v7 = vpop.f32.mrb[51].mxu0  ;;  %v3055_v60 = vpop.f32.mrb[51].mxu1  ;;  %v1576_v2 = vrot.slane %v849_v55, 3  ;;  %v1397_v15 = vadd.f32 %v2986_v29, %v2960_v13 }
 0x197   : > { %v1707_v28 = vsel %vm1365_vm3, %v1650_v36, %v1642_v31  ;;  %v1655_v49 = vrot.slane %v1654_v37, 2  ;;  %v1625_v54 = vmax.f32 %v1609_v35, 0.0  ;;  %v1503_v40 = vrot.slane %v738_v7, 2 }
 0x198   : > { %v1659_v33 = vsel %vm1562_vm8, %v1626_v44, -inf  ;;  %v1432_v53 = vsel %vm1147_vm1, %v1430_v45, %v1431_v46  ;;  %v1467_v56 = vadd.f32 %v1431_v46, %v1395_v34  ;;  %v1577_v9 = vsel %vm1562_vm8, %v1575_v59, %v1576_v2 }
 0x199   : > { %v1656_v61 = vmax.f32 %v1654_v37, %v1655_v49  ;;  %v1660_v41 = vmax.f32 %v1625_v54, %v1659_v33  ;;  %v1466_v52 = vadd.f32 %v1432_v53, %v1394_v26  ;;  %v1504_v62 = vsel %vm1220_vm2, %v1502_v63, %v1503_v40 }
 0x19a   : > { %v1539_v47 = vadd.f32 %v1503_v40, %v1467_v56  ;;  %v1398_v53 = vadd.f32 %v2986_v29, %v2966_v38 }
 0x19b   : > { %v1657_v57 = vrot.slane %v1656_v61, 1  ;;  %v1661_v3 = vrot.slane %v1660_v41, 4  ;;  %v1538_v6 = vadd.f32 %v1504_v62, %v1466_v52  ;;  %v742_v8 = vpop.f32.mrb[52].mxu0  ;;  %v855_v20 = vpop.f32.mrb[52].mxu1 }
 0x19c   : > { %v1612_v10 = vadd.f32 %v1576_v2, %v1539_v47  ;;  %v744_v12 = vpop.f32.mrb[53].mxu0  ;;  %v1433_v22 = vrot.slane %v742_v8, 1  ;;  %v3063_v27 = vpop.f32.mrb[53].mxu1  ;;  %v1578_v43 = vrot.slane %v855_v20, 3 }
 0x19d   : > { %v1658_v16 = vmax.f32 %v1656_v61, %v1657_v57  ;;  %v1662_v17 = vmax.f32 %v1660_v41, %v1661_v3  ;;  %v1611_v18 = vadd.f32 %v1577_v9, %v1538_v6  ;;  %v746_v25 = vpop.f32.mrb[54].mxu0  ;;  %v1505_v23 = vrot.slane %v744_v12, 2  ;;  %v859_v37 = vpop.f32.mrb[54].mxu1 }
 0x19e   : > { %v1628_v21 = vmax.f32 %v1612_v10, 0.0  ;;  %v1434_v26 = vrot.slane %v746_v25, 1  ;;  %v748_v34 = vpop.f32.mrb[55].mxu0  ;;  %v3068_v44 = vpop.f32.mrb[55].mxu1  ;;  %v1579_v54 = vrot.slane %v859_v37, 3  ;;  %v1399_v41 = vadd.f32 %v2986_v29, %v2970_v51 }
 0x19f   : > { %v1708_v1 = vsel %vm1367_vm4, %v1658_v16, %v1707_v28  ;;  %v1663_v30 = vrot.slane %v1662_v17, 2  ;;  %v1627_v31 = vmax.f32 %v1611_v18, 0.0  ;;  %v1506_v36 = vrot.slane %v748_v34, 2 }
 0x1a0   : > { %v1667_v13 = vsel %vm1562_vm8, %v1628_v21, -inf  ;;  %v1435_v35 = vsel %vm1147_vm1, %v1433_v22, %v1434_v26  ;;  %v1469_v42 = vadd.f32 %v1434_v26, %v1397_v15  ;;  %v1580_v56 = vsel %vm1562_vm8, %v1578_v43, %v1579_v54 }
 0x1a1   : > { %v1664_v45 = vmax.f32 %v1662_v17, %v1663_v30  ;;  %v1668_v63 = vmax.f32 %v1627_v31, %v1667_v13  ;;  %v1468_v46 = vadd.f32 %v1435_v35, %v1396_v4  ;;  %v1507_v7 = vsel %vm1220_vm2, %v1505_v23, %v1506_v36 }
 0x1a2   : > { %v1541_v49 = vadd.f32 %v1506_v36, %v1469_v42  ;;  %v1400_v35 = vadd.f32 %v2986_v29, %v2976_v14  ;;  %v3094_v14 = vld [vmem:[%s3281_s2 + $0x2] ss:$0 sm:$0xff] }
 0x1a3   : > { %v1665_v28 = vrot.slane %v1664_v45, 1  ;;  %v1669_v40 = vrot.slane %v1668_v63, 4  ;;  %v1540_v55 = vadd.f32 %v1507_v7, %v1468_v46  ;;  %v752_v33 = vpop.f32.mrb[56].mxu0  ;;  %v865_v57 = vpop.f32.mrb[56].mxu1 }
 0x1a4   : > { %v1614_v59 = vadd.f32 %v1579_v54, %v1541_v49  ;;  %v754_v61 = vpop.f32.mrb[57].mxu0  ;;  %v1436_v6 = vrot.slane %v752_v33, 1  ;;  %v3076_v10 = vpop.f32.mrb[57].mxu1  ;;  %v1581_v20 = vrot.slane %v865_v57, 3 }
 0x1a5   : > { %v1666_v52 = vmax.f32 %v1664_v45, %v1665_v28  ;;  %v1670_v62 = vmax.f32 %v1668_v63, %v1669_v40  ;;  %v1613_v47 = vadd.f32 %v1580_v56, %v1540_v55  ;;  %v756_v2 = vpop.f32.mrb[58].mxu0  ;;  %v1508_v8 = vrot.slane %v754_v61, 2  ;;  %v869_v17 = vpop.f32.mrb[58].mxu1 }
 0x1a6   : > { %v1630_v3 = vmax.f32 %v1614_v59, 0.0  ;;  %v1437_v4 = vrot.slane %v756_v2, 1  ;;  %v758_v9 = vpop.f32.mrb[59].mxu0  ;;  %v3081_v21 = vpop.f32.mrb[59].mxu1  ;;  %v1582_v31 = vrot.slane %v869_v17, 3  ;;  %v1401_v63 = vadd.f32 %v2986_v29, %v2980_v24 }
 0x1a7   : > { %v1709_v38 = vsel %vm1369_vm5, %v1666_v52, %v1708_v1  ;;  %v1671_v12 = vrot.slane %v1670_v62, 2  ;;  %v1629_v15 = vmax.f32 %v1613_v47, 0.0  ;;  %v1509_v16 = vrot.slane %v758_v9, 2 }
 0x1a8   : > { %v1675_v51 = vsel %vm1562_vm8, %v1630_v3, -inf  ;;  %v1438_v18 = vsel %vm1147_vm1, %v1436_v6, %v1437_v4  ;;  %v1471_v25 = vadd.f32 %v1437_v4, %v1399_v41  ;;  %v1583_v42 = vsel %vm1562_vm8, %v1581_v20, %v1582_v31 }
 0x1a9   : > { %v1672_v22 = vmax.f32 %v1670_v62, %v1671_v12  ;;  %v1676_v23 = vmax.f32 %v1629_v15, %v1675_v51  ;;  %v1470_v26 = vadd.f32 %v1438_v18, %v1398_v53  ;;  %v1510_v34 = vsel %vm1220_vm2, %v1508_v8, %v1509_v16 }
 0x1aa   : > { %v1543_v30 = vadd.f32 %v1509_v16, %v1471_v25  ;;  %v1722_v16 = vadd.f32 %v3094_v14, %v2998_v5  ;;  %v3108_v20 = vadd.f32 %v3094_v14, %v3006_v39 }
 0x1ab   : > { %v1673_v1 = vrot.slane %v1672_v22, 1  ;;  %v1677_v36 = vrot.slane %v1676_v23, 4  ;;  %v1542_v37 = vadd.f32 %v1510_v34, %v1470_v26  ;;  %v762_v13 = vpop.f32.mrb[60].mxu0  ;;  %v875_v28 = vpop.f32.mrb[60].mxu1 }
 0x1ac   : > { %v1616_v43 = vadd.f32 %v1582_v31, %v1543_v30  ;;  %v764_v45 = vpop.f32.mrb[61].mxu0  ;;  %v1439_v55 = vrot.slane %v762_v13, 1  ;;  %v3089_v59 = vpop.f32.mrb[61].mxu1  ;;  %v1584_v57 = vrot.slane %v875_v28, 3 }
 0x1ad   : > { %v1674_v46 = vmax.f32 %v1672_v22, %v1673_v1  ;;  %v1678_v7 = vmax.f32 %v1676_v23, %v1677_v36  ;;  %v1615_v49 = vadd.f32 %v1583_v42, %v1542_v37  ;;  %v766_v54 = vpop.f32.mrb[62].mxu0  ;;  %v1511_v33 = vrot.slane %v764_v45, 2  ;;  %v879_v52 = vpop.f32.mrb[62].mxu1 }
 0x1ae   : > { %v1632_v40 = vmax.f32 %v1616_v43, 0.0  ;;  %v1440_v53 = vrot.slane %v766_v54, 1  ;;  %v768_v56 = vpop.f32.mrb[63].mxu0  ;;  %v3099_v3 = vpop.f32.mrb[63].mxu1  ;;  %v1585_v15 = vrot.slane %v879_v52, 3  ;;  %v3112_v22 = vadd.f32 %v3094_v14, %v3011_v50 }
 0x1af   : > { %v1710_v61 = vsel %vm1371_vm6, %v1674_v46, %v1709_v38  ;;  %v1679_v24 = vrot.slane %v1678_v7, 2  ;;  %v1631_v29 = vmax.f32 %v1615_v49, 0.0  ;;  %v1512_v41 = vrot.slane %v768_v56, 2 }
 0x1b0   : > { %v1683_v62 = vsel %vm1562_vm8, %v1632_v40, -inf  ;;  %v1441_v47 = vsel %vm1147_vm1, %v1439_v55, %v1440_v53  ;;  %v1473_v2 = vadd.f32 %v1440_v53, %v1401_v63  ;;  %v1721_v38 = vadd.f32 %v3094_v14, %v2994_v58 }
 0x1b1   : > { %v1680_v6 = vmax.f32 %v1678_v7, %v1679_v24  ;;  %v1684_v8 = vmax.f32 %v1631_v29, %v1683_v62  ;;  %v1472_v4 = vadd.f32 %v1441_v47, %v1400_v35  ;;  %v1513_v9 = vsel %vm1220_vm2, %v1511_v33, %v1512_v41 }
 0x1b2   : > { %v1545_v12 = vadd.f32 %v1512_v41, %v1473_v2  ;;  %v1586_v58 = vsel %vm1562_vm8, %v1584_v57, %v1585_v15  ;;  %v3127_v62 = vadd.f32 %v3094_v14, %v3030_v32 }
 0x1b3   : > { %v1681_v17 = vrot.slane %v1680_v6, 1  ;;  %v1685_v51 = vrot.slane %v1684_v8, 4  ;;  %v1544_v18 = vadd.f32 %v1513_v9, %v1472_v4  ;;  %v918_v25 = vpop.f32.mrb[64].mxu0  ;;  %v1031_v36 = vpop.f32.mrb[64].mxu1 }
 0x1b4   : > { %v1618_v23 = vadd.f32 %v1585_v15, %v1545_v12  ;;  %v920_v26 = vpop.f32.mrb[65].mxu0  ;;  %v1753_v5 = vrot.slane %v918_v25, 1  ;;  %v1897_v42 = vrot.slane %v1031_v36, 3  ;;  %v1033_v43 = vpop.f32.mrb[65].mxu1 }
 0x1b5   : > { %v1682_v34 = vmax.f32 %v1680_v6, %v1681_v17  ;;  %v1686_v30 = vmax.f32 %v1684_v8, %v1685_v51  ;;  %v1617_v31 = vadd.f32 %v1586_v58, %v1544_v18  ;;  %v922_v1 = vpop.f32.mrb[66].mxu0  ;;  %v1825_v13 = vrot.slane %v920_v26, 2  ;;  %v1035_v7 = vpop.f32.mrb[66].mxu1 }
 0x1b6   : > { %v1634_v37 = vmax.f32 %v1618_v23, 0.0  ;;  %v1754_v35 = vrot.slane %v922_v1, 1  ;;  %v924_v39 = vpop.f32.mrb[67].mxu0  ;;  %v1970_v40 = vrot.slane %v1033_v43, 4  ;;  %v1037_v55 = vpop.f32.mrb[67].mxu1  ;;  %v1898_v41 = vrot.slane %v1035_v7, 3 }
 0x1b7   : > { %v3116_v45 = vsel %vm1373_vm7, %v1682_v34, %v1710_v61  ;;  %v1687_v50 = vrot.slane %v1686_v30, 2  ;;  %v1633_v63 = vmax.f32 %v1617_v31, 0.0  ;;  %v1826_v46 = vrot.slane %v924_v39, 2 }
 0x1b8   : > { %v1691_v49 = vsel %vm1562_vm8, %v1634_v37, -inf  ;;  %v1755_v54 = vsel %vm1147_vm1, %v1753_v5, %v1754_v35  ;;  %v1794_v28 = vadd.f32 %v1754_v35, %v1722_v16  ;;  %v3123_v61 = vadd.f32 %v3094_v14, %v3020_v19 }
 0x1b9   : > { %v1688_v33 = vmax.f32 %v1686_v30, %v1687_v50  ;;  %v1692_v53 = vmax.f32 %v1633_v63, %v1691_v49  ;;  %v1793_v56 = vadd.f32 %v1755_v54, %v1721_v38  ;;  %v1827_v24 = vsel %vm1220_vm2, %v1825_v13, %v1826_v46 }
 0x1ba   : > { %v1866_v29 = vadd.f32 %v1826_v46, %v1794_v28  ;;  %v1971_v52 = vrot.slane %v1037_v55, 4  ;;  %v3131_v8 = vadd.f32 %v3094_v14, %v3038_v0  ;;  %v1899_v4 = vsel %vm1562_vm8, %v1897_v42, %v1898_v41 }
 0x1bb   : > { %v1689_v47 = vrot.slane %v1688_v33, 1  ;;  %v1693_v2 = vrot.slane %v1692_v53, 4  ;;  %v1865_v57 = vadd.f32 %v1827_v24, %v1793_v56  ;;  %v928_v6 = vpop.f32.mrb[68].mxu0  ;;  %v1041_v51 = vpop.f32.mrb[68].mxu1 }
 0x1bc   : > { %v1938_v9 = vadd.f32 %v1898_v41, %v1866_v29  ;;  %v1972_v19 = vsel %vm1969_vm11, %v1970_v40, %v1971_v52  ;;  %v930_v38 = vpop.f32.mrb[69].mxu0  ;;  %v1756_v17 = vrot.slane %v928_v6, 1  ;;  %v1900_v23 = vrot.slane %v1041_v51, 3  ;;  %v1043_v34 = vpop.f32.mrb[69].mxu1 }
 0x1bd   : > { %v1690_v12 = vmax.f32 %v1688_v33, %v1689_v47  ;;  %v1694_v15 = vmax.f32 %v1692_v53, %v1693_v2  ;;  %v1937_v16 = vadd.f32 %v1899_v4, %v1865_v57  ;;  %v932_v32 = vpop.f32.mrb[70].mxu0  ;;  %v1828_v25 = vrot.slane %v930_v38, 2  ;;  %v1045_v1 = vpop.f32.mrb[70].mxu1 }
 0x1be   : > { %v2011_v18 = vadd.f32 %v1971_v52, %v1938_v9  ;;  %v1757_v58 = vrot.slane %v932_v32, 1  ;;  %v934_v26 = vpop.f32.mrb[71].mxu0  ;;  %v1973_v5 = vrot.slane %v1043_v34, 4  ;;  %v1901_v35 = vrot.slane %v1045_v1, 3  ;;  %v1047_v42 = vpop.f32.mrb[71].mxu1 }
 0x1bf   : > { %v1695_v0 = vrot.slane %v1694_v15, 2  ;;  %v2010_v30 = vadd.f32 %v1972_v19, %v1937_v16  ;;  %v1829_v31 = vrot.slane %v934_v26, 2  ;;  %v1974_v54 = vrot.slane %v1047_v42, 4 }
 0x1c0   : > { %v2027_v36 = vmax.f32 %v2011_v18, 0.0  ;;  %v1758_v37 = vsel %vm1147_vm1, %v1756_v17, %v1757_v58  ;;  %v1796_v13 = vadd.f32 %v1757_v58, %v3112_v22  ;;  %v1902_v49 = vsel %vm1562_vm8, %v1900_v23, %v1901_v35 }
 0x1c1   : > { %v1696_v39 = vmax.f32 %v1694_v15, %v1695_v0  ;;  %v2026_v43 = vmax.f32 %v2010_v30, 0.0  ;;  %v1795_v50 = vadd.f32 %v1758_v37, %v3108_v20  ;;  %v1830_v63 = vsel %vm1220_vm2, %v1828_v25, %v1829_v31 }
 0x1c2   : > { %v2042_v46 = vsel %vm1969_vm11, %v2027_v36, -inf  ;;  %v1868_v7 = vadd.f32 %v1829_v31, %v1796_v13  ;;  %v1712_v22 = vsel %vm1375_vm9, %v1690_v12, %v3116_v45  ;;  %v3145_v53 = vadd.f32 %v3094_v14, %v3042_v11 }
 0x1c3   : > { %v1697_v28 = vrot.slane %v1696_v39, 1  ;;  %v2043_v40 = vmax.f32 %v2026_v43, %v2042_v46  ;;  %v1867_v55 = vadd.f32 %v1830_v63, %v1795_v50  ;;  %v938_v33 = vpop.f32.mrb[72].mxu0  ;;  %v3149_v20 = vadd.f32 %v3094_v14, %v3050_v48  ;;  %v1051_v6 = vpop.f32.mrb[72].mxu1 }
 0x1c4   : > { %v1940_v56 = vadd.f32 %v1901_v35, %v1868_v7  ;;  %v1975_v24 = vsel %vm1969_vm11, %v1973_v5, %v1974_v54  ;;  %v940_v29 = vpop.f32.mrb[73].mxu0  ;;  %v1759_v2 = vrot.slane %v938_v33, 1  ;;  %v1903_v19 = vrot.slane %v1051_v6, 3  ;;  %v1053_v38 = vpop.f32.mrb[73].mxu1 }
 0x1c5   : > { %v1698_v41 = vmax.f32 %v1696_v39, %v1697_v28  ;;  %v2044_v52 = vrot.slane %v2043_v40, 4  ;;  %v1939_v47 = vadd.f32 %v1902_v49, %v1867_v55  ;;  %v942_v57 = vpop.f32.mrb[74].mxu0  ;;  %v1831_v45 = vrot.slane %v940_v29, 2  ;;  %v1055_v17 = vpop.f32.mrb[74].mxu1 }
 0x1c6   : > { %v2013_v4 = vadd.f32 %v1974_v54, %v1940_v56  ;;  %v1760_v9 = vrot.slane %v942_v57, 1  ;;  %v944_v11 = vpop.f32.mrb[75].mxu0  ;;  %v1976_v16 = vrot.slane %v1053_v38, 4  ;;  %v1904_v25 = vrot.slane %v1055_v17, 3  ;;  %v1057_v58 = vpop.f32.mrb[75].mxu1 }
 0x1c7   : > { %v2045_v12 = vmax.f32 %v2043_v40, %v2044_v52  ;;  %v2012_v15 = vadd.f32 %v1975_v24, %v1939_v47  ;;  %v1832_v48 = vrot.slane %v944_v11, 2  ;;  %v1977_v1 = vrot.slane %v1057_v58, 4 }
 0x1c8   : > { %v2029_v32 = vmax.f32 %v2013_v4, 0.0  ;;  %v1761_v51 = vsel %vm1147_vm1, %v1759_v2, %v1760_v9  ;;  %v1798_v18 = vadd.f32 %v1760_v9, %v3127_v62  ;;  %v1905_v5 = vsel %vm1562_vm8, %v1903_v19, %v1904_v25 }
 0x1c9   : > { %v2046_v23 = vrot.slane %v2045_v12, 2  ;;  %v2028_v26 = vmax.f32 %v2012_v15, 0.0  ;;  %v1797_v34 = vadd.f32 %v1761_v51, %v3123_v61  ;;  %v1833_v0 = vsel %vm1220_vm2, %v1831_v45, %v1832_v48 }
 0x1ca   : > { %v2050_v30 = vsel %vm1969_vm11, %v2029_v32, -inf  ;;  %v1870_v31 = vadd.f32 %v1832_v48, %v1798_v18  ;;  %v1713_v62 = vsel %vm1377_vm10, %v1698_v41, %v1712_v22  ;;  %v3161_v42 = vadd.f32 %v3094_v14, %v3055_v60 }
 0x1cb   : > { %v2047_v36 = vmax.f32 %v2045_v12, %v2046_v23  ;;  %v2051_v37 = vmax.f32 %v2028_v26, %v2050_v30  ;;  %v1869_v13 = vadd.f32 %v1833_v0, %v1797_v34  ;;  %v948_v35 = vpop.f32.mrb[76].mxu0  ;;  %v3165_v61 = vadd.f32 %v3094_v14, %v3063_v27  ;;  %1715 = vst [vmem:[%s3025_s5 + $0x8] sm:$0xff] %v1713_v62  ;;  %v1061_v28 = vpop.f32.mrb[76].mxu1 }
 0x1cc   : > { %v1942_v39 = vadd.f32 %v1904_v25, %v1870_v31  ;;  %v1978_v43 = vsel %vm1969_vm11, %v1976_v16, %v1977_v1  ;;  %v950_v50 = vpop.f32.mrb[77].mxu0  ;;  %v3171_v63 = vadd.f32 %v3094_v14, %v3068_v44  ;;  %v1762_v49 = vrot.slane %v948_v35, 1  ;;  %v1063_v22 = vpop.f32.mrb[77].mxu1 }
 0x1cd   : > { %v2052_v46 = vrot.slane %v2051_v37, 4  ;;  %v1941_v7 = vadd.f32 %v1905_v5, %v1869_v13  ;;  %v952_v54 = vpop.f32.mrb[78].mxu0  ;;  %v2048_v60 = vrot.slane %v2047_v36, 1  ;;  %v1834_v55 = vrot.slane %v950_v50, 2  ;;  %v1065_v52 = vpop.f32.mrb[78].mxu1 }
 0x1ce   : > { %v2015_v40 = vadd.f32 %v1977_v1, %v1942_v39  ;;  %v1763_v33 = vrot.slane %v952_v54, 1  ;;  %v954_v27 = vpop.f32.mrb[79].mxu0  ;;  %v1906_v29 = vrot.slane %v1061_v28, 3  ;;  %v1979_v57 = vrot.slane %v1063_v22, 4  ;;  %v1067_v6 = vpop.f32.mrb[79].mxu1 }
 0x1cf   : > { %v2053_v56 = vmax.f32 %v2051_v37, %v2052_v46  ;;  %v2014_v24 = vadd.f32 %v1978_v43, %v1941_v7  ;;  %v1835_v41 = vrot.slane %v954_v27, 2  ;;  %v1907_v12 = vrot.slane %v1065_v52, 3 }
 0x1d0   : > { %v2031_v47 = vmax.f32 %v2015_v40, 0.0  ;;  %v1764_v44 = vsel %vm1147_vm1, %v1762_v49, %v1763_v33  ;;  %v1800_v2 = vadd.f32 %v1763_v33, %v3145_v53  ;;  %v1980_v15 = vrot.slane %v1067_v6, 4 }
 0x1d1   : > { %v2054_v4 = vrot.slane %v2053_v56, 2  ;;  %v2030_v45 = vmax.f32 %v2014_v24, 0.0  ;;  %v1799_v9 = vadd.f32 %v1764_v44, %v3131_v8  ;;  %v1836_v19 = vsel %vm1220_vm2, %v1834_v55, %v1835_v41 }
 0x1d2   : > { %v2058_v11 = vsel %vm1969_vm11, %v2031_v47, -inf  ;;  %v1872_v38 = vadd.f32 %v1835_v41, %v1800_v2  ;;  %v3180_v48 = vadd.f32 %v3094_v14, %v3076_v10  ;;  %v2049_v51 = vmax.f32 %v2047_v36, %v2048_v60 }
 0x1d3   : > { %v2055_v16 = vmax.f32 %v2053_v56, %v2054_v4  ;;  %v2059_v17 = vmax.f32 %v2030_v45, %v2058_v11  ;;  %v1871_v53 = vadd.f32 %v1836_v19, %v1799_v9  ;;  %v958_v32 = vpop.f32.mrb[80].mxu0  ;;  %v1908_v18 = vsel %vm1562_vm8, %v1906_v29, %v1907_v12  ;;  %v1071_v31 = vpop.f32.mrb[80].mxu1 }
 0x1d4   : > { %v1944_v25 = vadd.f32 %v1907_v12, %v1872_v38  ;;  %v1981_v8 = vsel %vm1969_vm11, %v1979_v57, %v1980_v15  ;;  %v960_v58 = vpop.f32.mrb[81].mxu0  ;;  %v1765_v0 = vrot.slane %v958_v32, 1  ;;  %v1909_v37 = vrot.slane %v1071_v31, 3  ;;  %v1073_v35 = vpop.f32.mrb[81].mxu1 }
 0x1d5   : > { %v2056_v23 = vrot.slane %v2055_v16, 1  ;;  %v2060_v26 = vrot.slane %v2059_v17, 4  ;;  %v1943_v34 = vadd.f32 %v1908_v18, %v1871_v53  ;;  %v962_v30 = vpop.f32.mrb[82].mxu0  ;;  %v1837_v10 = vrot.slane %v960_v58, 2  ;;  %v1075_v50 = vpop.f32.mrb[82].mxu1 }
 0x1d6   : > { %v2017_v5 = vadd.f32 %v1980_v15, %v1944_v25  ;;  %v1766_v1 = vrot.slane %v962_v30, 1  ;;  %v964_v13 = vpop.f32.mrb[83].mxu0  ;;  %v1982_v54 = vrot.slane %v1073_v35, 4  ;;  %v1077_v28 = vpop.f32.mrb[83].mxu1  ;;  %v1910_v24 = vrot.slane %v1075_v50, 3 }
 0x1d7   : > { %v2057_v62 = vmax.f32 %v2055_v16, %v2056_v23  ;;  %v2061_v36 = vmax.f32 %v2059_v17, %v2060_v26  ;;  %v2016_v39 = vadd.f32 %v1981_v8, %v1943_v34  ;;  %v1838_v43 = vrot.slane %v964_v13, 2 }
 0x1d8   : > { %v2033_v46 = vmax.f32 %v2017_v5, 0.0  ;;  %v1767_v7 = vsel %vm1147_vm1, %v1765_v0, %v1766_v1  ;;  %v1802_v49 = vadd.f32 %v1766_v1, %v3161_v42  ;;  %v1983_v47 = vrot.slane %v1077_v28, 4 }
 0x1d9   : > { %v2114_v60 = vsel %vm1365_vm3, %v2057_v62, %v2049_v51  ;;  %v2062_v40 = vrot.slane %v2061_v36, 2  ;;  %v2032_v55 = vmax.f32 %v2016_v39, 0.0  ;;  %v1801_v33 = vadd.f32 %v1767_v7, %v3149_v20 }
 0x1da   : > { %v2066_v27 = vsel %vm1969_vm11, %v2033_v46, -inf  ;;  %v1839_v22 = vsel %vm1220_vm2, %v1837_v10, %v1838_v43  ;;  %v1874_v56 = vadd.f32 %v1838_v43, %v1802_v49  ;;  %v3192_v42 = vadd.f32 %v3094_v14, %v3081_v21 }
 0x1db   : > { %v2063_v29 = vmax.f32 %v2061_v36, %v2062_v40  ;;  %v2067_v41 = vmax.f32 %v2032_v55, %v2066_v27  ;;  %v1873_v52 = vadd.f32 %v1839_v22, %v1801_v33  ;;  %v968_v44 = vpop.f32.mrb[84].mxu0  ;;  %v1911_v2 = vsel %vm1562_vm8, %v1909_v37, %v1910_v24  ;;  %v1081_v38 = vpop.f32.mrb[84].mxu1 }
 0x1dc   : > { %v1946_v57 = vadd.f32 %v1910_v24, %v1874_v56  ;;  %v1768_v6 = vrot.slane %v968_v44, 1  ;;  %v970_v20 = vpop.f32.mrb[85].mxu0  ;;  %v1984_v19 = vsel %vm1969_vm11, %v1982_v54, %v1983_v47  ;;  %v1912_v17 = vrot.slane %v1081_v38, 3  ;;  %v1083_v32 = vpop.f32.mrb[85].mxu1 }
 0x1dd   : > { %v2064_v4 = vrot.slane %v2063_v29, 1  ;;  %v2068_v45 = vrot.slane %v2067_v41, 4  ;;  %v1945_v9 = vadd.f32 %v1911_v2, %v1873_v52  ;;  %v972_v11 = vpop.f32.mrb[86].mxu0  ;;  %v1840_v15 = vrot.slane %v970_v20, 2  ;;  %v1085_v8 = vpop.f32.mrb[86].mxu1 }
 0x1de   : > { %v2019_v12 = vadd.f32 %v1983_v47, %v1946_v57  ;;  %v1769_v16 = vrot.slane %v972_v11, 1  ;;  %v974_v53 = vpop.f32.mrb[87].mxu0  ;;  %v1985_v34 = vrot.slane %v1083_v32, 4  ;;  %v1087_v0 = vpop.f32.mrb[87].mxu1  ;;  %v1913_v35 = vrot.slane %v1085_v8, 3 }
 0x1df   : > { %v2065_v21 = vmax.f32 %v2063_v29, %v2064_v4  ;;  %v2069_v51 = vmax.f32 %v2067_v41, %v2068_v45  ;;  %v2018_v18 = vadd.f32 %v1984_v19, %v1945_v9  ;;  %v1841_v25 = vrot.slane %v974_v53, 2 }
 0x1e0   : > { %v2035_v58 = vmax.f32 %v2019_v12, 0.0  ;;  %v1770_v23 = vsel %vm1147_vm1, %v1768_v6, %v1769_v16  ;;  %v1804_v26 = vadd.f32 %v1769_v16, %v3171_v63  ;;  %v1986_v43 = vrot.slane %v1087_v0, 4 }
 0x1e1   : > { %v2115_v30 = vsel %vm1367_vm4, %v2065_v21, %v2114_v60  ;;  %v2070_v31 = vrot.slane %v2069_v51, 2  ;;  %v2034_v5 = vmax.f32 %v2018_v18, 0.0  ;;  %v1803_v10 = vadd.f32 %v1770_v23, %v3165_v61 }
 0x1e2   : > { %v2074_v1 = vsel %vm1969_vm11, %v2035_v58, -inf  ;;  %v1842_v37 = vsel %vm1220_vm2, %v1840_v15, %v1841_v25  ;;  %v1876_v13 = vadd.f32 %v1841_v25, %v1804_v26  ;;  %v3204_v63 = vadd.f32 %v3094_v14, %v3089_v59 }
 0x1e3   : > { %v2071_v62 = vmax.f32 %v2069_v51, %v2070_v31  ;;  %v2075_v36 = vmax.f32 %v2034_v5, %v2074_v1  ;;  %v1875_v39 = vadd.f32 %v1842_v37, %v1803_v10  ;;  %v978_v50 = vpop.f32.mrb[88].mxu0  ;;  %v1914_v46 = vsel %vm1562_vm8, %v1912_v17, %v1913_v35  ;;  %v1091_v33 = vpop.f32.mrb[88].mxu1 }
 0x1e4   : > { %v1948_v7 = vadd.f32 %v1913_v35, %v1876_v13  ;;  %v1771_v49 = vrot.slane %v978_v50, 1  ;;  %v980_v61 = vpop.f32.mrb[89].mxu0  ;;  %v1987_v40 = vsel %vm1969_vm11, %v1985_v34, %v1986_v43  ;;  %v1915_v24 = vrot.slane %v1091_v33, 3  ;;  %v1093_v41 = vpop.f32.mrb[89].mxu1 }
 0x1e5   : > { %v2072_v54 = vrot.slane %v2071_v62, 1  ;;  %v2076_v28 = vrot.slane %v2075_v36, 4  ;;  %v1947_v60 = vadd.f32 %v1914_v46, %v1875_v39  ;;  %v982_v55 = vpop.f32.mrb[90].mxu0  ;;  %v1843_v22 = vrot.slane %v980_v61, 2  ;;  %v1095_v2 = vpop.f32.mrb[90].mxu1 }
 0x1e6   : > { %v2021_v27 = vadd.f32 %v1986_v43, %v1948_v7  ;;  %v1772_v56 = vrot.slane %v982_v55, 1  ;;  %v984_v29 = vpop.f32.mrb[91].mxu0  ;;  %v1988_v4 = vrot.slane %v1093_v41, 4  ;;  %v1097_v45 = vpop.f32.mrb[91].mxu1  ;;  %v1916_v17 = vrot.slane %v1095_v2, 3 }
 0x1e7   : > { %v2073_v59 = vmax.f32 %v2071_v62, %v2072_v54  ;;  %v2077_v52 = vmax.f32 %v2075_v36, %v2076_v28  ;;  %v2020_v47 = vadd.f32 %v1987_v40, %v1947_v60  ;;  %v1844_v44 = vrot.slane %v984_v29, 2 }
 0x1e8   : > { %v2037_v57 = vmax.f32 %v2021_v27, 0.0  ;;  %v1773_v6 = vsel %vm1147_vm1, %v1771_v49, %v1772_v56  ;;  %v1806_v20 = vadd.f32 %v1772_v56, %v3192_v42  ;;  %v1989_v51 = vrot.slane %v1097_v45, 4 }
 0x1e9   : > { %v2116_v9 = vsel %vm1369_vm5, %v2073_v59, %v2115_v30  ;;  %v2078_v19 = vrot.slane %v2077_v52, 2  ;;  %v2036_v11 = vmax.f32 %v2020_v47, 0.0  ;;  %v1805_v38 = vadd.f32 %v1773_v6, %v3180_v48 }
 0x1ea   : > { %v2082_v12 = vsel %vm1969_vm11, %v2037_v57, -inf  ;;  %v1845_v15 = vsel %vm1220_vm2, %v1843_v22, %v1844_v44  ;;  %v1878_v16 = vadd.f32 %v1844_v44, %v1806_v20  ;;  %v1736_v42 = vadd.f32 %v3094_v14, %v3099_v3 }
 0x1eb   : > { %v2079_v53 = vmax.f32 %v2077_v52, %v2078_v19  ;;  %v2083_v32 = vmax.f32 %v2036_v11, %v2082_v12  ;;  %v1877_v21 = vadd.f32 %v1845_v15, %v1805_v38  ;;  %v988_v18 = vpop.f32.mrb[92].mxu0  ;;  %v1917_v25 = vsel %vm1562_vm8, %v1915_v24, %v1916_v17  ;;  %v1101_v31 = vpop.f32.mrb[92].mxu1 }
 0x1ec   : > { %v1950_v8 = vadd.f32 %v1916_v17, %v1878_v16  ;;  %v1774_v58 = vrot.slane %v988_v18, 1  ;;  %v990_v23 = vpop.f32.mrb[93].mxu0  ;;  %v1990_v0 = vsel %vm1969_vm11, %v1988_v4, %v1989_v51  ;;  %v1918_v37 = vrot.slane %v1101_v31, 3  ;;  %v1103_v35 = vpop.f32.mrb[93].mxu1 }
 0x1ed   : > { %v2080_v48 = vrot.slane %v2079_v53, 1  ;;  %v2084_v26 = vrot.slane %v2083_v32, 4  ;;  %v1949_v34 = vadd.f32 %v1917_v25, %v1877_v21  ;;  %v992_v30 = vpop.f32.mrb[94].mxu0  ;;  %v1846_v10 = vrot.slane %v990_v23, 2  ;;  %v1105_v39 = vpop.f32.mrb[94].mxu1 }
 0x1ee   : > { %v2023_v5 = vadd.f32 %v1989_v51, %v1950_v8  ;;  %v1775_v1 = vrot.slane %v992_v30, 1  ;;  %v994_v13 = vpop.f32.mrb[95].mxu0  ;;  %v1991_v7 = vrot.slane %v1103_v35, 4  ;;  %v1107_v49 = vpop.f32.mrb[95].mxu1  ;;  %v1919_v27 = vrot.slane %v1105_v39, 3 }
 0x1ef   : > { %v2081_v62 = vmax.f32 %v2079_v53, %v2080_v48  ;;  %v2085_v14 = vmax.f32 %v2083_v32, %v2084_v26  ;;  %v2022_v3 = vadd.f32 %v1990_v0, %v1949_v34  ;;  %v1847_v36 = vrot.slane %v994_v13, 2 }
 0x1f0   : > { %v2039_v43 = vmax.f32 %v2023_v5, 0.0  ;;  %v1776_v50 = vsel %vm1147_vm1, %v1774_v58, %v1775_v1  ;;  %v1808_v46 = vadd.f32 %v1775_v1, %v1736_v42  ;;  %v1992_v29 = vrot.slane %v1107_v49, 4 }
 0x1f1   : > { %v2117_v61 = vsel %vm1371_vm6, %v2081_v62, %v2116_v9  ;;  %v2086_v54 = vrot.slane %v2085_v14, 2  ;;  %v2038_v28 = vmax.f32 %v2022_v3, 0.0  ;;  %v1807_v60 = vadd.f32 %v1776_v50, %v3204_v63 }
 0x1f2   : > { %v2090_v40 = vsel %vm1969_vm11, %v2039_v43, -inf  ;;  %v1848_v55 = vsel %vm1220_vm2, %v1846_v10, %v1847_v36  ;;  %v1880_v33 = vadd.f32 %v1847_v36, %v1808_v46  ;;  %v1920_v41 = vsel %vm1562_vm8, %v1918_v37, %v1919_v27 }
 0x1f3   : > { %v2087_v22 = vmax.f32 %v2085_v14, %v2086_v54  ;;  %v2091_v56 = vmax.f32 %v2038_v28, %v2090_v40  ;;  %v1879_v24 = vadd.f32 %v1848_v55, %v1807_v60  ;;  %v1993_v2 = vsel %vm1969_vm11, %v1991_v7, %v1992_v29 }
 0x1f4   : > { %v1952_v59 = vadd.f32 %v1919_v27, %v1880_v33 }
 0x1f5   : > { %v2088_v52 = vrot.slane %v2087_v22, 1  ;;  %v2092_v47 = vrot.slane %v2091_v56, 4  ;;  %v1951_v44 = vadd.f32 %v1920_v41, %v1879_v24 }
 0x1f6   : > { %v2025_v57 = vadd.f32 %v1992_v29, %v1952_v59 }
 0x1f7   : > { %v2089_v63 = vmax.f32 %v2087_v22, %v2088_v52  ;;  %v2093_v6 = vmax.f32 %v2091_v56, %v2092_v47  ;;  %v2024_v20 = vadd.f32 %v1993_v2, %v1951_v44 }
 0x1f8   : > { %v2041_v4 = vmax.f32 %v2025_v57, 0.0 }
 0x1f9   : > { %v2118_v45 = vsel %vm1373_vm7, %v2089_v63, %v2117_v61  ;;  %v2094_v9 = vrot.slane %v2093_v6, 2  ;;  %v2040_v19 = vmax.f32 %v2024_v20, 0.0 }
 0x1fa   : > { %v2098_v11 = vsel %vm1969_vm11, %v2041_v4, -inf }
 0x1fb   : > { %v2095_v38 = vmax.f32 %v2093_v6, %v2094_v9  ;;  %v2099_v12 = vmax.f32 %v2040_v19, %v2098_v11 }
 0x1fd   : > { %v2096_v15 = vrot.slane %v2095_v38, 1  ;;  %v2100_v16 = vrot.slane %v2099_v12, 4 }
 0x1ff   : > { %v2097_v17 = vmax.f32 %v2095_v38, %v2096_v15  ;;  %v2101_v53 = vmax.f32 %v2099_v12, %v2100_v16 }
 0x201   : > { %v2102_v32 = vrot.slane %v2101_v53, 2  ;;  %v2119_v21 = vsel %vm1375_vm9, %v2097_v17, %v2118_v45 }
 0x203   : > { %v2103_v51 = vmax.f32 %v2101_v53, %v2102_v32 }
 0x205   : > { %v2104_v18 = vrot.slane %v2103_v51, 1 }
 0x207   : > { %v2105_v42 = vmax.f32 %v2103_v51, %v2104_v18 }
 0x209   : > { %v2120_v25 = vsel %vm1377_vm10, %v2105_v42, %v2119_v21 }
 0x20a   : > { %2122 = vst [vmem:[%s3025_s5 + $0x10] sm:$0xff] %v2120_v25 }
 0x20b   : > { %2496 = shalt.err (!%p2493_p7)
}
 0x20c   : > { %s2497_s6 = scalar_lea.hbm %s3233_s30, 384  ;;  %s2501_s4 = scalar_lea.hbm %s3282_s3, 768 }
 0x20d   : > { %p2498_p9 = scmp.ne.s32.totalorder %s3233_s30, %s2497_s6  ;;  %p2502_p5 = scmp.lt.u32.totalorder %s3233_s30, %s3282_s3 }
 0x20e   : > { %p2503_p11 = scmp.lt.u32.totalorder %s2501_s4, %s2497_s6  ;;  %p2505_p4 = scmp.lt.u32.totalorder %s2497_s6, %s3233_s30 }
 0x20f   : > { %p2499_p2 = pnand %p2498_p9, %p2674_p12 }
 0x210   : > { %p2504_p1 = por %p2503_p11, %p2502_p5 }
 0x211   : > { %p2500_p0 = pneg %p2499_p2 }
 0x212   : > { %p2506_p6 = por %p2505_p4, %p2504_p1 }
 0x214   : > { %p2507_p8 = pnand %p2506_p6, %p2500_p0 }
 0x216   : > { %2510 = shalt.err (!%p2507_p8)
}
 0x217   : > { %2325 = dma.vmem_to_hbm [thread:$0]  (%p2674_p12), %s3235_s28, 384, %s3233_s30, %s2124_s22  }
 0x218 PF: > { %s2150_s5 = sand.u32 1, %s2541_s12   ;;  %p3297_p10 = scmp.ne.s32.totalorder %s3287_s19, 0 }
 0x219   : > { %p3298_p13 = scmp.ge.s32.totalorder %s2553_s15, 2  ;;  %s2151_s10 = scalar_lea.sflag [#allocation4], %s2150_s5 }
 0x21b   : > { %p2336_p3 = pnand %p3298_p13, %p3297_p10 }
 0x21d   : > { %2536 = dma.done.wait (!%p2336_p3), %s2151_s10, 384  }
 0x21e   : > { %2538 = vsyncadd (!%p2336_p3), %s2151_s10, 4294966912  ;;  %p17_p7 = scmp.ge.s32.totalorder %s2639_s24, 4   ;;  %s3299_s12 = smov %s2545_s13 }
 0x21f   : > { %s3300_s13 = smov %s2549_s14  ;;  %s3301_s14 = smov %s2670_s17 }
 0x220   : > { %s3302_s15 = smov %s2639_s24  ;;  %19 = sbr.rel (!%p17_p7) target bundleno = 6 (0x6), region = 81 }
 0x227   :  { %2156 = vsyncpa [#allocation3], 1 }
 0x228   :  { %2158 = vsyncpa [#allocation3 + $0x1], 1 }
 0x229   :  { %2159 = vsyncpa [#allocation6], 1 }
 0x22a   :  { %2160 = vsyncpa [#allocation4], 1 }
 0x22b   :  { %2162 = vsyncpa [#allocation4 + $0x1], 1 }

</bundles_post_ra>
